<compile_context>
chip_gen: v7x
topology: tpu7x:2x2x1
jax: 0.10.0
libtpu: 0.0.40
codegen_flags: <defaults>
</compile_context>

<pallas_src>
import jax
import jax.numpy as jnp
from jax.experimental import pallas as pl
from jax.experimental.pallas import tpu as pltpu


def autoencoder_kernel(x_ref, wg_ref, bg_ref, wh_ref, bh_ref, out_ref):
    # x arrives f32 from HBM; cast to bf16 in-VMEM (VPU has slack) so both
    # matmuls run as bf16 MXU passes with f32 accumulation.
    x = x_ref[...].astype(jnp.bfloat16)                               # (TB, in_dim)
    h = jnp.dot(x, wg_ref[...], preferred_element_type=jnp.float32)   # (TB, k) f32
    h = jax.nn.sigmoid(h + bg_ref[...])                               # bias + sigmoid in f32

    h = h.astype(jnp.bfloat16)
    o = jnp.dot(h, wh_ref[...], preferred_element_type=jnp.float32)   # (TB, nq) f32
    o = jax.nn.sigmoid(o + bh_ref[...])

    out_ref[...] = o.astype(out_ref.dtype)


def _round_up(n, m):
    return ((n + m - 1) // m) * m


def autoencoder_forward(x, wg_t, bg, wh_t, bh, *, tb_max=2048,
                        out_dtype=jnp.float32):
    """x: (B, in_dim), wg_t: (in_dim, k), bg: (1, k),
       wh_t: (k, nq), bh: (1, nq)  ->  (B, nq) out_dtype."""
    B, in_dim = x.shape
    k = wg_t.shape[1]
    nq = wh_t.shape[1]
    assert bg.shape == (1, k) and bh.shape == (1, nq)

    # Weights/biases are tiny; cast once.  bf16 weights feed the MXU; biases
    # stay f32 so the add + sigmoid happen at full precision.
    # (Keep weights f32 instead if exact parity with the f32 model matters.)
    wg_bf = wg_t.astype(jnp.bfloat16)
    wh_bf = wh_t.astype(jnp.bfloat16)
    bg_f32 = bg.astype(jnp.float32)
    bh_f32 = bh.astype(jnp.float32)

    if B <= 512:
        # Single block: whole problem fits comfortably in VMEM; skip the grid
        # (no pipeline prologue/epilogue scaffolding for a size-1 grid).
        vmem = pl.BlockSpec(memory_space=pltpu.MemorySpace.VMEM)
        return pl.pallas_call(
            autoencoder_kernel,
            out_shape=jax.ShapeDtypeStruct((B, nq), out_dtype),
            in_specs=[vmem, vmem, vmem, vmem, vmem],
            out_specs=vmem,
        )(x, wg_bf, bg_f32, wh_bf, bh_f32)

    # Batch tile: big enough to amortize the ~0.35 us per-step overhead,
    # small enough to keep >= 4 grid steps (2 per TC on v7x) and to stay far
    # under the scoped-VMEM defaults (v5e 16 MiB / v6e, v7x 32 MiB) even
    # double-buffered: tb=2048 -> ~3 MB x-tile + ~2 MB out-tile, x2 buffers.
    tb = min(tb_max, _round_up(pl.cdiv(B, 4), 16))
    tb = max(tb, 128)
    grid = (pl.cdiv(B, tb),)   # ragged last block handled by Pallas

    return pl.pallas_call(
        autoencoder_kernel,
        out_shape=jax.ShapeDtypeStruct((B, nq), out_dtype),
        grid_spec=pltpu.PrefetchScalarGridSpec(
            num_scalar_prefetch=0,
            grid=grid,
            in_specs=[
                # x / out tiles are double-buffered per grid step.
                pl.BlockSpec((tb, in_dim), lambda i: (i, 0)),
                # Weights/biases: constant block index -> stay VMEM-resident.
                pl.BlockSpec((in_dim, k), lambda i: (0, 0)),
                pl.BlockSpec((1, k), lambda i: (0, 0)),
                pl.BlockSpec((k, nq), lambda i: (0, 0)),
                pl.BlockSpec((1, nq), lambda i: (0, 0)),
            ],
            out_specs=pl.BlockSpec((tb, nq), lambda i: (i, 0)),
        ),
        compiler_params=pltpu.CompilerParams(
            dimension_semantics=("parallel",)),
    )(x, wg_bf, bg_f32, wh_bf, bh_f32)


def init_params(key, num_question, ability_dim, k):
    """Deterministic init mirroring nn.Linear's uniform(-1/sqrt(fan_in), ...)."""
    in_dim = num_question + ability_dim
    k1, k2, k3, k4 = jax.random.split(key, 4)
    bound_g = 1.0 / jnp.sqrt(in_dim)
    bound_h = 1.0 / jnp.sqrt(k)
    # Stored already transposed for the kernel: (in_features, out_features).
    wg_t = jax.random.uniform(k1, (in_dim, k), jnp.float32, -bound_g, bound_g)
    bg = jax.random.uniform(k2, (1, k), jnp.float32, -bound_g, bound_g)
    wh_t = jax.random.uniform(k3, (k, num_question), jnp.float32, -bound_h, bound_h)
    bh = jax.random.uniform(k4, (1, num_question), jnp.float32, -bound_h, bound_h)
    return wg_t, bg, wh_t, bh


if __name__ == "__main__":
    # Tile-friendly shapes implied by the module:
    #   num_question = 256, ability features = 128 (so in_dim = 384), k = 128.
    #   batch = 1000 (not a tile multiple) -> 4 grid steps incl. a ragged
    #   last block, exercising the no-pad / no-slice path.
    num_question = 256
    ability_dim = 128
    k = 128
    batch = 1000

    key = jax.random.PRNGKey(0)
    kx, kp = jax.random.split(key)

    # "user vector": concatenation of question responses and ability features.
    x = jax.random.uniform(kx, (batch, num_question + ability_dim), jnp.float32)
    wg_t, bg, wh_t, bh = init_params(kp, num_question, ability_dim, k)

    out = jax.block_until_ready(autoencoder_forward(x, wg_t, bg, wh_t, bh))

    # Cross-check against a plain JAX f32 reference of the same math
    # (bf16 matmul operands with f32 accumulation -> relaxed tolerance).
    ref = jax.nn.sigmoid(jax.nn.sigmoid(x @ wg_t + bg) @ wh_t + bh)
    assert out.shape == (batch, num_question)
    assert jnp.allclose(out, ref, atol=2e-2, rtol=2e-2)

    # Also check the single-block (no-grid) path with a tiny batch.
    out_small = jax.block_until_ready(
        autoencoder_forward(x[:8], wg_t, bg, wh_t, bh))
    assert out_small.shape == (8, num_question)
    assert jnp.allclose(out_small, ref[:8], atol=2e-2, rtol=2e-2)

    # Optional bf16 output path (halves writeback bytes for mem-bound cases).
    out_bf16 = jax.block_until_ready(
        autoencoder_forward(x, wg_t, bg, wh_t, bh, out_dtype=jnp.bfloat16))
    assert out_bf16.dtype == jnp.bfloat16
    assert jnp.allclose(out_bf16.astype(jnp.float32), ref, atol=3e-2, rtol=3e-2)

    print("KERNEL_OK")
</pallas_src>

<mosaic_0001>
module attributes {stable_mosaic.version = 11 : i64} {
  func.func @autoencoder_kernel(%arg0: i32, %arg1: memref<256x384xf32, #tpu.memory_space<vmem>>, %arg2: memref<384x128xbf16, #tpu.memory_space<vmem>>, %arg3: memref<1x128xf32, #tpu.memory_space<vmem>>, %arg4: memref<128x256xbf16, #tpu.memory_space<vmem>>, %arg5: memref<1x256xf32, #tpu.memory_space<vmem>>, %arg6: memref<256x256xf32, #tpu.memory_space<vmem>>) attributes {dimension_semantics = [#tpu.dimension_semantics<parallel>], iteration_bounds = array<i64: 4>, scalar_prefetch = 0 : i64, scratch_operands = 0 : i64, tpu.core_type = #tpu.core_type<tc>, window_params = [{transform_indices = @transform_0, window_bounds = array<i64: 256, 384>}, {pipeline_mode = #tpu.pipeline_mode<synchronous>, transform_indices = @transform_1, window_bounds = array<i64: 384, 128>}, {pipeline_mode = #tpu.pipeline_mode<synchronous>, transform_indices = @transform_2, window_bounds = array<i64: 1, 128>}, {pipeline_mode = #tpu.pipeline_mode<synchronous>, transform_indices = @transform_3, window_bounds = array<i64: 128, 256>}, {pipeline_mode = #tpu.pipeline_mode<synchronous>, transform_indices = @transform_4, window_bounds = array<i64: 1, 256>}, {transform_indices = @transform_5, window_bounds = array<i64: 256, 256>}]} {
    %c0 = arith.constant 0 : index
    %c0_0 = arith.constant 0 : index
    %0 = vector.load %arg1[%c0, %c0_0] : memref<256x384xf32, #tpu.memory_space<vmem>>, vector<256x384xf32>
    %1 = arith.truncf %0 : vector<256x384xf32> to vector<256x384xbf16>
    %c0_1 = arith.constant 0 : index
    %c0_2 = arith.constant 0 : index
    %2 = vector.load %arg2[%c0_1, %c0_2] : memref<384x128xbf16, #tpu.memory_space<vmem>>, vector<384x128xbf16>
    %cst = arith.constant dense<0.000000e+00> : vector<256x128xf32>
    %3 = tpu.matmul %1, %2, %cst {dimension_numbers = #tpu.dot_dimension_numbers<[1], [0], [0], [1], [0, 0, 1, 1], [], []>} : vector<256x384xbf16>, vector<384x128xbf16>, vector<256x128xf32> -> vector<256x128xf32>
    %c0_3 = arith.constant 0 : index
    %c0_4 = arith.constant 0 : index
    %4 = vector.load %arg3[%c0_3, %c0_4] : memref<1x128xf32, #tpu.memory_space<vmem>>, vector<1x128xf32>
    %5 = vector.broadcast %4 : vector<1x128xf32> to vector<256x128xf32>
    %6 = arith.addf %3, %5 : vector<256x128xf32>
    %7 = arith.negf %6 : vector<256x128xf32>
    %8 = math.exp %7 : vector<256x128xf32>
    %cst_5 = arith.constant 1.000000e+00 : f32
    %9 = vector.broadcast %cst_5 : f32 to vector<256x128xf32>
    %10 = arith.addf %9, %8 : vector<256x128xf32>
    %11 = arith.divf %9, %10 : vector<256x128xf32>
    %12 = arith.truncf %11 : vector<256x128xf32> to vector<256x128xbf16>
    %c0_6 = arith.constant 0 : index
    %c0_7 = arith.constant 0 : index
    %13 = vector.load %arg4[%c0_6, %c0_7] : memref<128x256xbf16, #tpu.memory_space<vmem>>, vector<128x256xbf16>
    %cst_8 = arith.constant dense<0.000000e+00> : vector<256x256xf32>
    %14 = tpu.matmul %12, %13, %cst_8 {dimension_numbers = #tpu.dot_dimension_numbers<[1], [0], [0], [1], [0, 0, 1, 1], [], []>} : vector<256x128xbf16>, vector<128x256xbf16>, vector<256x256xf32> -> vector<256x256xf32>
    %c0_9 = arith.constant 0 : index
    %c0_10 = arith.constant 0 : index
    %15 = vector.load %arg5[%c0_9, %c0_10] : memref<1x256xf32, #tpu.memory_space<vmem>>, vector<1x256xf32>
    %16 = vector.broadcast %15 : vector<1x256xf32> to vector<256x256xf32>
    %17 = arith.addf %14, %16 : vector<256x256xf32>
    %18 = arith.negf %17 : vector<256x256xf32>
    %19 = math.exp %18 : vector<256x256xf32>
    %cst_11 = arith.constant 1.000000e+00 : f32
    %20 = vector.broadcast %cst_11 : f32 to vector<256x256xf32>
    %21 = arith.addf %20, %19 : vector<256x256xf32>
    %22 = arith.divf %20, %21 : vector<256x256xf32>
    %c0_12 = arith.constant 0 : index
    %c0_13 = arith.constant 0 : index
    %23 = vector.load %arg6[%c0_12, %c0_13] : memref<256x256xf32, #tpu.memory_space<vmem>>, vector<256x256xf32>
    tpu.vector_store %arg6[%c0_12, %c0_13], %22 {strides = array<i32>} : memref<256x256xf32, #tpu.memory_space<vmem>>, vector<256x256xf32>,
    return
  }
  func.func @transform_0(%arg0: i32) -> (i32, i32) {
    %c0_i32 = arith.constant 0 : i32
    %c0_i32_0 = arith.constant 0 : i32
    return %arg0, %c0_i32 : i32, i32
  }
  func.func @transform_1(%arg0: i32) -> (i32, i32) {
    %c0_i32 = arith.constant 0 : i32
    %c0_i32_0 = arith.constant 0 : i32
    %c0_i32_1 = arith.constant 0 : i32
    return %c0_i32, %c0_i32_0 : i32, i32
  }
  func.func @transform_2(%arg0: i32) -> (i32, i32) {
    %c0_i32 = arith.constant 0 : i32
    %c0_i32_0 = arith.constant 0 : i32
    %c0_i32_1 = arith.constant 0 : i32
    return %c0_i32, %c0_i32_0 : i32, i32
  }
  func.func @transform_3(%arg0: i32) -> (i32, i32) {
    %c0_i32 = arith.constant 0 : i32
    %c0_i32_0 = arith.constant 0 : i32
    %c0_i32_1 = arith.constant 0 : i32
    return %c0_i32, %c0_i32_0 : i32, i32
  }
  func.func @transform_4(%arg0: i32) -> (i32, i32) {
    %c0_i32 = arith.constant 0 : i32
    %c0_i32_0 = arith.constant 0 : i32
    %c0_i32_1 = arith.constant 0 : i32
    return %c0_i32, %c0_i32_0 : i32, i32
  }
  func.func @transform_5(%arg0: i32) -> (i32, i32) {
    %c0_i32 = arith.constant 0 : i32
    %c0_i32_0 = arith.constant 0 : i32
    return %arg0, %c0_i32 : i32, i32
  }
}

</mosaic_0001>

<bundles_post_ra>
// kernel: tpu_custom_call.1
= control target key start
LH: loop header
LB: loop body
LE: loop exit
PB: predicated region body
PF: predicated region fallthrough
CT: control target
= control target key end

     0   :  { %s3963_s0 = inlined_call_operand.hbm [shape: f32[1000,384], index: 0, kind: input, shape index: {}]   ;;  %s3964_s1 = inlined_call_operand.hbm [shape: bf16[384,128], index: 1, kind: input, shape index: {}]   ;;  %s3965_s2 = inlined_call_operand.hbm [shape: f32[1,128], index: 2, kind: input, shape index: {}]   ;;  %s3966_s3 = inlined_call_operand.hbm [shape: bf16[128,256], index: 3, kind: input, shape index: {}]   ;;  %s3967_s4 = inlined_call_operand.hbm [shape: f32[1,256], index: 4, kind: input, shape index: {}]   ;;  %s3968_s5 = inlined_call_operand.hbm [shape: f32[1000,256], index: 5, kind: output, shape index: {}]  }
   0x1   :  { %3976 = sst [smem:[#allocation20_spill]] %s3964_s1 }
   0x2   :  { %10 = vsyncpa [#allocation3], 0 }
   0x3   :  { %12 = vsyncpa [#allocation3 + $0x1], 0 }
   0x4   :  { %13 = vsyncpa [#allocation6], 0 }
   0x5   :  { %14 = vsyncpa [#allocation9], 0 }
   0x6   :  { %15 = vsyncpa [#allocation4], 0 }
   0x7   :  { %17 = vsyncpa [#allocation4 + $0x1], 0  ;;  %s3229_s18 = smov 0   ;;  %s3231_s19 = smov 0  }
   0x8   :  { %s3233_s20 = smov 0   ;;  %s3235_s21 = smov 0  }
   0x9 LB: > { %3977 = sst [smem:[#allocation16_spill]] %s3170_s18  ;;  %s3250_s22 = sadd.s32 4294967295, %s3182_s21   ;;  %s3182_s21 = sphi %s3235_s21, %s4000_s21   ;;  %s3178_s20 = sphi %s3233_s20, %s4004_s20   ;;  %s3174_s19 = sphi %s3231_s19, %s4003_s19   ;;  %s3170_s18 = sphi %s3229_s18, %s4002_s18  }
   0xa   : > { %s2073_s23 = sadd.s32 4294967294, %s3182_s21   ;;  %s3254_s24 = sadd.s32 1, %s3182_s21  }
   0xb   : > { %3978 = sst [smem:[#allocation17_spill]] %s3254_s24  ;;  %s30_s25 = sadd.s32 1, %s3178_s20 }
   0xc   : > { %s27_s26 = ssub.s32 %s3182_s21, %s3254_s24  ;;  %p37_p0 = scmp.ne.s32.totalorder %s3178_s20, %s3174_s19 }
   0xd   : > { %p28_p1 = scmp.eq.s32.totalorder %s27_s26, 0  ;;  %p38_p2 = scmp.eq.s32.totalorder %s3182_s21, 0 }
   0xe   : > { %p43_p3 = scmp.ne.s32.totalorder %s3174_s19, %s3170_s18  ;;  %p3969_p4 = scmp.eq.s32.totalorder %s3250_s22, 0 }
   0xf   : > { %s3266_s27 = scalar_select %p28_p1, %s3178_s20, %s30_s25  }
  0x10   : > { %p3268_p5 = por %p38_p2, %p37_p0  ;;  %p3274_p6 = por %p3969_p4, %p43_p3 }
  0x11   : > { %3979 = sst [smem:[#allocation18_spill]] %s3266_s27  ;;  %p151_p7 = scmp.eq.s32.totalorder %s3250_s22, 3 }
  0x12   : > { %s3980_s28 = scalar_select %p3268_p5, 1, 0 }
  0x13   : > { %s3981_s29 = scalar_select %p3274_p6, 1, 0 }
  0x14   : > { %p157_p8 = scmp.eq.s32.totalorder %s2073_s23, 3  ;;  %p2074_p9 = scmp.ge.s32.totalorder %s3182_s21, 1 }
  0x15   : > { %p164_p10 = scmp.lt.s32.totalorder %s3182_s21, 5  ;;  %p3281_p11 = por %p151_p7, %p37_p0 }
  0x16   : > { %p3285_p12 = por %p157_p8, %p43_p3  ;;  %s3184_s8 = smov [#allocation5]  }
  0x17   : > { %s3982_s30 = scalar_select %p3281_p11, 1, 0 }
  0x18   : > { %s3983_s6 = scalar_select %p3285_p12, 1, 0 }
  0x19   : > { %p3289_p13 = pnand %p2074_p9, %p164_p10  ;;  %s176_s9 = sshll.u32 %s3184_s8, 4  ;;  %s177_s9 = int_to_ptr.vmem [resolvable:$true] %s176_s9 }
  0x1a   : > { %3984 = sst [smem:[#allocation19_spill]] %s3983_s6  ;;  %s3185_s11 = smov [#allocation8]  }
  0x1b   : > { %s3985_s7 = scalar_select %p3289_p13, 1, 0 }
  0x1c   : > { %p2465_p1 = pneg %p3289_p13  ;;  %s200_s12 = sshll.u32 %s3185_s11, 4  ;;  %s3301_s12 = int_to_ptr.vmem [resolvable:$true] %s200_s12 }
  0x1d   : > { %s3987_s1 = sld [smem:[#allocation20_spill]] }
  0x1e   : > { %p3297_p2 = pnand %p2465_p1, %p3969_p4 }
  0x20   : > { %p3311_p3 = pneg %p3297_p2 }
  0x23   : > { %s2968_s15 = scalar_lea.hbm %s3987_s1, 3072 }
  0x24   : > { %p2969_p0 = scmp.ne.s32.totalorder %s3987_s1, %s2968_s15  ;;  %p2975_p9 = scmp.lt.u32.totalorder %s2968_s15, %s3987_s1 }
  0x26   : > { %p2971_p7 = pnand %p3311_p3, %p2969_p0 }
  0x28   : > { %p2972_p8 = pneg %p2971_p7 }
  0x2a   : > { %p2977_p10 = pnand %p2975_p9, %p2972_p8 }
  0x2c   : > { %2980 = shalt.err (!%p2977_p10)
}
  0x2d   : > { %s2981_s8 = scalar_lea.vmem %s177_s9, 3072  ;;  %p2989_p11 = scmp.lt.s32.totalorder %s177_s9, %s177_s9 }
  0x2e   : > { %p2982_p1 = scmp.ne.s32.totalorder %s177_s9, %s2981_s8  ;;  %p2990_p6 = scmp.lt.s32.totalorder %s2981_s8, %s2981_s8 }
  0x30   : > { %p2984_p4 = pnand %p2982_p1, %p3311_p3  ;;  %p2991_p13 = por %p2990_p6, %p2989_p11 }
  0x32   : > { %p2985_p12 = pneg %p2984_p4 }
  0x34   : > { %p2992_p5 = pnand %p2991_p13, %p2985_p12 }
  0x36   : > { %2995 = shalt.err (!%p2992_p5)
}
  0x37   : > { %s3186_s11 = smov 64   ;;  %s3187_s13 = smov 4  }
  0x38   : > { %2468 = dma.hbm_to_vmem [thread:$0]  (!%p3297_p2), %s3987_s1, 3072, %s177_s9, [#allocation6], %s3186_s11, %s3186_s11, %s3187_s13  }
  0x39   : > { %s2996_s25 = scalar_lea.hbm %s3966_s3, 2048 }
  0x3a   : > { %p2997_p4 = scmp.ne.s32.totalorder %s3966_s3, %s2996_s25  ;;  %p3003_p11 = scmp.lt.u32.totalorder %s2996_s25, %s3966_s3 }
  0x3c   : > { %p2999_p6 = pnand %p2997_p4, %p3311_p3 }
  0x3e   : > { %p3000_p5 = pneg %p2999_p6 }
  0x40   : > { %p3005_p12 = pnand %p3003_p11, %p3000_p5 }
  0x42   : > { %3008 = shalt.err (!%p3005_p12)
}
  0x43   : > { %s3009_s9 = scalar_lea.vmem %s3301_s12, 2048  ;;  %p3017_p8 = scmp.lt.s32.totalorder %s3301_s12, %s3301_s12 }
  0x44   : > { %p3010_p13 = scmp.ne.s32.totalorder %s3301_s12, %s3009_s9  ;;  %p3018_p9 = scmp.lt.s32.totalorder %s3009_s9, %s3009_s9 }
  0x46   : > { %p3012_p0 = pnand %p3010_p13, %p3311_p3  ;;  %p3019_p10 = por %p3018_p9, %p3017_p8 }
  0x48   : > { %p3013_p7 = pneg %p3012_p0 }
  0x4a   : > { %p3020_p1 = pnand %p3019_p10, %p3013_p7 }
  0x4c   : > { %3023 = shalt.err (!%p3020_p1)
}
  0x4d   : > { %s3188_s27 = smov 128   ;;  %s3189_s24 = smov 8  }
  0x4e   : > { %2474 = dma.hbm_to_vmem [thread:$0]  (!%p3297_p2), %s3966_s3, 2048, %s3301_s12, [#allocation9], %s3188_s27, %s3188_s27, %s3189_s24  }
  0x4f   : > { %s3190_s14 = smov [#allocation7]   ;;  %s3191_s16 = smov [#allocation10]  }
  0x50   : > { %s190_s15 = sshll.u32 %s3190_s14, 4  ;;  %s214_s17 = sshll.u32 %s3191_s16, 4  ;;  %s191_s15 = int_to_ptr.vmem [resolvable:$true] %s190_s15  ;;  %s215_s17 = int_to_ptr.vmem [resolvable:$true] %s214_s17 }
  0x51   : > { %s3024_s8 = scalar_lea.hbm %s3965_s2, 16 }
  0x52   : > { %p3025_p4 = scmp.ne.s32.totalorder %s3965_s2, %s3024_s8  ;;  %p3031_p11 = scmp.lt.u32.totalorder %s3024_s8, %s3965_s2 }
  0x54   : > { %p3027_p6 = pnand %p3025_p4, %p3311_p3 }
  0x56   : > { %p3028_p5 = pneg %p3027_p6 }
  0x58   : > { %p3033_p12 = pnand %p3031_p11, %p3028_p5 }
  0x5a   : > { %3036 = shalt.err (!%p3033_p12)
}
  0x5b   : > { %s3037_s12 = scalar_lea.vmem %s191_s15, 16  ;;  %s3044_s27 = scalar_lea.vmem %s191_s15, 32 }
  0x5c   : > { %p3038_p13 = scmp.ne.s32.totalorder %s191_s15, %s3037_s12  ;;  %p3045_p8 = scmp.lt.s32.totalorder %s191_s15, %s191_s15 }
  0x5d   : > { %p3046_p9 = scmp.lt.s32.totalorder %s3044_s27, %s3037_s12 }
  0x5e   : > { %p3040_p0 = pnand %p3038_p13, %p3311_p3 }
  0x5f   : > { %p3047_p10 = por %p3046_p9, %p3045_p8 }
  0x60   : > { %p3041_p7 = pneg %p3040_p0 }
  0x62   : > { %p3048_p1 = pnand %p3047_p10, %p3041_p7 }
  0x64   : > { %3051 = shalt.err (!%p3048_p1)
}
  0x65   : > { %2471 = dma.hbm_to_vmem [thread:$0]  (!%p3297_p2), %s3965_s2, 16, %s191_s15, [#allocation6]  }
  0x66   : > { %s3052_s11 = scalar_lea.hbm %s3967_s4, 32 }
  0x67   : > { %p3053_p4 = scmp.ne.s32.totalorder %s3967_s4, %s3052_s11  ;;  %p3059_p11 = scmp.lt.u32.totalorder %s3052_s11, %s3967_s4 }
  0x69   : > { %p3055_p6 = pnand %p3053_p4, %p3311_p3 }
  0x6b   : > { %p3056_p5 = pneg %p3055_p6 }
  0x6d   : > { %p3061_p12 = pnand %p3059_p11, %p3056_p5 }
  0x6f   : > { %3064 = shalt.err (!%p3061_p12)
}
  0x70   : > { %s3065_s26 = scalar_lea.vmem %s215_s17, 32  ;;  %p3073_p8 = scmp.lt.s32.totalorder %s215_s17, %s215_s17 }
  0x71   : > { %p3066_p13 = scmp.ne.s32.totalorder %s215_s17, %s3065_s26  ;;  %p3074_p9 = scmp.lt.s32.totalorder %s3065_s26, %s3065_s26 }
  0x73   : > { %p3068_p0 = pnand %p3066_p13, %p3311_p3  ;;  %p3075_p10 = por %p3074_p9, %p3073_p8 }
  0x75   : > { %p3069_p7 = pneg %p3068_p0 }
  0x77   : > { %p3076_p1 = pnand %p3075_p10, %p3069_p7 }
  0x79   : > { %3079 = shalt.err (!%p3076_p1)
}
  0x7a   : > { %2477 = dma.hbm_to_vmem [thread:$0]  (!%p3297_p2), %s3967_s4, 32, %s215_s17, [#allocation9]  }
  0x7b   : > { %p2079_p4 = scmp.ge.s32.totalorder %s3182_s21, 4 }
  0x7c   : > { %p3989_p6 = scmp.ne.s32.totalorder (!%p2079_p4), %s3980_s28, 0 }
  0x7d   : > { %221 = sbr.rel (%p2079_p4) target bundleno = 168 (0xa8), region = 32 }
  0x84   : > { %224 = sbr.rel (!%p3989_p6) target bundleno = 168 (0xa8), region = 36  ;;  %s225_s23 = sand.u32 (%p3989_p6), 1, %s3178_s20  }
  0x85   : > { %s2080_s9 = sshll.u32 (%p3989_p6), %s3182_s21, 5  ;;  %s2444_s12 = smul.u32 (%p3989_p6), 768, %s225_s23 }
  0x86   : > { %s231_s27 = ssub.s32 (%p3989_p6), 125, %s2080_s9  ;;  %s3394_s24 = scalar_lea.sflag (%p3989_p6), [#allocation3], %s225_s23 }
  0x87   : > { %p232_p3 = scmp.lt.s32.totalorder (%p3989_p6), %s231_s27, 32  ;;  %s229_s17 = scalar_lea.vmem (%p3989_p6), [#allocation2], %s2444_s12 }
  0x8b   : > { %s4006_s27 = smov (!%p232_p3, %s231_s27), 32 }
  0x8c   : > { %s3391_s1 = smul.u32 384, %s4006_s27 }
  0x8e   : > { %s237_s10 = ssub.s32 12288, %s3391_s1 }
  0x8f   : > { %238 = vsyncadd %s3394_s24, %s237_s10  ;;  %p2083_p2 = scmp.ne.s32.totalorder %s3391_s1, 0  ;;  %s2445_s28 = smul.u32 12288, %s3182_s21 }
  0x90   : > { %s244_s18 = sshll.u32 %s229_s17, 4  ;;  %s3084_s26 = scalar_lea.hbm %s3963_s0, 48000  ;;  %s3404_s18 = int_to_ptr.vmem [resolvable:$true] %s244_s18 }
  0x91   : > { %s3402_s13 = scalar_lea.hbm %s3963_s0, %s2445_s28 }
  0x92   : > { %s3080_s14 = scalar_lea.hbm %s3402_s13, %s3391_s1  ;;  %p3085_p13 = scmp.lt.u32.totalorder %s3402_s13, %s3963_s0 }
  0x93   : > { %p3081_p5 = scmp.ne.s32.totalorder %s3402_s13, %s3080_s14  ;;  %p3086_p0 = scmp.lt.u32.totalorder %s3084_s26, %s3080_s14 }
  0x94   : > { %p3088_p8 = scmp.lt.u32.totalorder %s3080_s14, %s3402_s13 }
  0x95   : > { %p3082_p11 = pnand %p3081_p5, %p2083_p2  ;;  %p3087_p7 = por %p3086_p0, %p3085_p13 }
  0x97   : > { %p3083_p12 = pneg %p3082_p11  ;;  %p3089_p9 = por %p3088_p8, %p3087_p7 }
  0x99   : > { %p3090_p10 = pnand %p3089_p9, %p3083_p12 }
  0x9b   : > { %3093 = shalt.err (!%p3090_p10)
}
  0x9c   : > { %s3094_s23 = scalar_lea.vmem %s3404_s18, %s3391_s1  ;;  %s3192_s9 = smov [#allocation2]  }
  0x9d   : > { %p3095_p1 = scmp.ne.s32.totalorder %s3404_s18, %s3094_s23  ;;  %s3098_s12 = sshll.u32 %s3192_s9, 4  ;;  %s3099_s12 = int_to_ptr.vmem [resolvable:$false] %s3098_s12 }
  0x9e   : > { %s3100_s27 = scalar_lea.vmem %s3099_s12, 24576  ;;  %p3101_p3 = scmp.lt.s32.totalorder %s3404_s18, %s3099_s12 }
  0x9f   : > { %p3096_p4 = pnand %p3095_p1, %p2083_p2  ;;  %p3102_p5 = scmp.lt.s32.totalorder %s3100_s27, %s3094_s23 }
  0xa1   : > { %p3097_p6 = pneg %p3096_p4  ;;  %p3103_p11 = por %p3102_p5, %p3101_p3 }
  0xa3   : > { %p3104_p13 = pnand %p3103_p11, %p3097_p6 }
  0xa5   : > { %3107 = shalt.err (!%p3104_p13)
}
  0xa6   : > { %s3193_s10 = smov 384   ;;  %s3194_s17 = smov 24  }
  0xa7   : > { %250 = dma.hbm_to_vmem [thread:$0]  (%p2083_p2), %s3402_s13, %s3391_s1, %s3404_s18, %s3394_s24, %s3193_s10, %s3193_s10, %s3194_s17  }
  0xa8 PF: > { %p3990_p12 = scmp.ne.s32.totalorder %s3985_s7, 0 }
  0xa9   : > { %s3434_s28 = sand.u32 (!%p3990_p12), 1, %s3174_s19   ;;  %p3991_p0 = scmp.ne.s32.totalorder (!%p3990_p12), %s3981_s29, 0 }
  0xaa   : > { %256 = sbr.rel (%p3990_p12) target bundleno = 990 (0x3de), region = 40  ;;  %s259_s11 = scalar_lea.sflag (!%p3990_p12), [#allocation3], %s3434_s28 }
  0xab   : > { %s2446_s6 = smul.u32 (!%p3990_p12), 768, %s3434_s28 }
  0xad   : > { %s3438_s14 = scalar_lea.vmem (!%p3990_p12), [#allocation2], %s2446_s6 }
  0xb1   : > { %3153 = dma.done.wait (%p3991_p0), %s259_s11, 12288  }
  0xb2   : > { %3155 = vsyncadd (%p3991_p0), %s259_s11, 4294955008  ;;  %p3992_p2 = scmp.eq.s32.totalorder %s3250_s22, 0 }
  0xb4   : > { %3157 = dma.done.wait (%p3992_p2), [#allocation6], 3088   ;;  %p3993_p7 = pmov %p3992_p2 }
  0xb5   : > { %p3994_p8 = pmov %p3992_p2 }
  0xb6   : > { %3159 = vsyncadd (%p3993_p7), [#allocation6], 4294964208 }
  0xb7   : > { %3161 = dma.done.wait (%p3994_p8), [#allocation9], 2080   ;;  %p3995_p9 = pmov %p3992_p2 }
  0xb8   : > { %v2536_v0 = vld [vmem:[#allocation5 + $0x40] sm:$0xff]   ;;  %v2538_v2 = vld [vmem:[#allocation5 + $0x48] sm:$0xff]   ;;  %v2540_v4 = vld [vmem:[#allocation5 + $0x50] sm:$0xff]   ;;  %s2092_s29 = sshll.u32 %s3434_s28, 9  ;;  %s1941_s1 = scalar_lea.sflag [#allocation4], %s3434_s28 }
  0xb9   : > { %3163 = vsyncadd (%p3995_p9), [#allocation9], 4294965216  ;;  %v2537_v1 = vld [vmem:[#allocation5] sm:$0xff]   ;;  %2244 = vmatprep.subr.bf16.mxu0 %v2536_v0  ;;  %v2539_v3 = vld [vmem:[#allocation5 + $0x8] sm:$0xff]   ;;  %s3787_s7 = scalar_lea.vmem [#allocation11], %s2092_s29  ;;  %p3996_p10 = scmp.ne.s32.totalorder %s3982_s30, 0 }
  0xba   : > { %2245 = vmatpush3.bf16.msra.mxu0 %v2537_v1  ;;  %v2541_v5 = vld [vmem:[#allocation5 + $0x10] sm:$0xff]   ;;  %v2542_v6 = vld [vmem:[#allocation5 + $0x58] sm:$0xff]   ;;  %v2544_v8 = vld [vmem:[#allocation5 + $0x60] sm:$0xff]   ;;  %s2231_s24 = sshll.u32 (%p3996_p10), %s3250_s22, 5 }
  0xbb   : > { %2246 = vmatprep.subr.bf16.mxu0 %v2538_v2  ;;  %v2543_v7 = vld [vmem:[#allocation5 + $0x18] sm:$0xff]   ;;  %v2545_v9 = vld [vmem:[#allocation5 + $0x20] sm:$0xff]   ;;  %v2546_v10 = vld [vmem:[#allocation5 + $0x68] sm:$0xff]   ;;  %s1949_s18 = ssub.s32 (%p3996_p10), 125, %s2231_s24 }
  0xbc   : > { %v319_v11 = vld [vmem:[%s3438_s14 + $0x8] sm:$0xff]  ;;  %v322_v12 = vld [vmem:[%s3438_s14 + $0x20] sm:$0xff]  ;;  %v2548_v16 = vld [vmem:[#allocation5 + $0x70] sm:$0xff]   ;;  %p1950_p1 = scmp.lt.s32.totalorder (%p3996_p10), %s1949_s18, 32 }
  0xbd   : > { %v415_v13 = vpack.c.bf16 %v322_v12, %v319_v11  ;;  %v2552_v14 = vld [vmem:[#allocation5 + $0x80] sm:$0xff]   ;;  %v2547_v15 = vld [vmem:[#allocation5 + $0x28] sm:$0xff]   ;;  %v2549_v18 = vld [vmem:[#allocation5 + $0x30] sm:$0xff]  }
  0xbe   : > { %2247 = vmatpush3.bf16.msra.mxu0 %v2539_v3  ;;  %2428 = vmatprep.subr.bf16.mxu1 %v2552_v14  ;;  %v2553_v17 = vld [vmem:[#allocation5 + $0x88] sm:$0xff]   ;;  %v2550_v19 = vld [vmem:[#allocation5 + $0x78] sm:$0xff]   ;;  %v2554_v20 = vld [vmem:[#allocation5 + $0x90] sm:$0xff]  }
  0xbf   : > { %2248 = vmatprep.subr.bf16.mxu0 %v2540_v4  ;;  %693 = vmatprep.mubr.bf16.mxu0 %v415_v13  ;;  %v2551_v21 = vld [vmem:[#allocation5 + $0x38] sm:$0xff]   ;;  %v318_v22 = vld [vmem:[%s3438_s14] sm:$0xff]  ;;  %v328_v25 = vld [vmem:[%s3438_s14 + $0x50] sm:$0xff] }
  0xc0   : > { %2436 = vmatpush3.bf16.msra.mxu1 %v2552_v14  ;;  %v321_v23 = vld [vmem:[%s3438_s14 + $0x18] sm:$0xff]  ;;  %v2556_v28 = vld [vmem:[#allocation5 + $0xa0] sm:$0xff]   ;;  %v324_v30 = vld [vmem:[%s3438_s14 + $0x30] sm:$0xff] }
  0xc1   : > { %2429 = vmatprep.subr.bf16.mxu1 %v2553_v17  ;;  %v325_v24 = vld [vmem:[%s3438_s14 + $0x38] sm:$0xff]  ;;  %v414_v27 = vpack.c.bf16 %v321_v23, %v318_v22  ;;  %v327_v31 = vld [vmem:[%s3438_s14 + $0x48] sm:$0xff]  ;;  %v334_v34 = vld [vmem:[%s3438_s14 + $0x80] sm:$0xff] }
  0xc2   : > { %2249 = vmatpush3.bf16.msra.mxu0 %v2541_v5  ;;  %v2555_v26 = vld [vmem:[#allocation5 + $0x98] sm:$0xff]   ;;  %v418_v29 = vpack.c.bf16 %v328_v25, %v325_v24  ;;  %v2557_v32 = vld [vmem:[#allocation5 + $0xa8] sm:$0xff]   ;;  %v368_v35 = vld [vmem:[%s3438_s14 + $0x190] sm:$0xff]  ;;  %v417_v38 = vpack.c.bf16 %v327_v31, %v324_v30 }
  0xc3   : > { %2250 = vmatprep.subr.bf16.mxu0 %v2542_v6  ;;  %v331_v33 = vld [vmem:[%s3438_s14 + $0x68] sm:$0xff]  ;;  %v2558_v39 = vld [vmem:[#allocation5 + $0xb0] sm:$0xff]   ;;  %v2559_v41 = vld [vmem:[#allocation5 + $0xb8] sm:$0xff]  }
  0xc4   : > { %2437 = vmatpush3.bf16.msra.mxu1 %v2553_v17  ;;  %v371_v36 = vld [vmem:[%s3438_s14 + $0x1a8] sm:$0xff]  ;;  %v421_v40 = vpack.c.bf16 %v334_v34, %v331_v33  ;;  %v330_v42 = vld [vmem:[%s3438_s14 + $0x60] sm:$0xff]  ;;  %v333_v43 = vld [vmem:[%s3438_s14 + $0x78] sm:$0xff] }
  0xc5   : > { %2430 = vmatprep.subr.bf16.mxu1 %v2554_v20  ;;  %v440_v37 = vpack.c.bf16 %v371_v36, %v368_v35  ;;  %v337_v44 = vld [vmem:[%s3438_s14 + $0x98] sm:$0xff]  ;;  %v340_v45 = vld [vmem:[%s3438_s14 + $0xb0] sm:$0xff]  ;;  %v374_v46 = vld [vmem:[%s3438_s14 + $0x1c0] sm:$0xff]  ;;  %v420_v48 = vpack.c.bf16 %v333_v43, %v330_v42 }
  0xc6   : > { %2251 = vmatpush3.bf16.msra.mxu0 %v2543_v7  ;;  %v377_v47 = vld [vmem:[%s3438_s14 + $0x1d8] sm:$0xff]  ;;  %v380_v49 = vld [vmem:[%s3438_s14 + $0x1f0] sm:$0xff]  ;;  %v383_v50 = vld [vmem:[%s3438_s14 + $0x208] sm:$0xff]  ;;  %v424_v51 = vpack.c.bf16 %v340_v45, %v337_v44 }
  0xc7   : > { %2252 = vmatprep.subr.bf16.mxu0 %v2544_v8  ;;  %2412 = vmatprep.mubr.bf16.mxu1 %v440_v37  ;;  %v443_v52 = vpack.c.bf16 %v377_v47, %v374_v46  ;;  %v446_v53 = vpack.c.bf16 %v383_v50, %v380_v49  ;;  %v336_v54 = vld [vmem:[%s3438_s14 + $0x90] sm:$0xff]  ;;  %v339_v55 = vld [vmem:[%s3438_s14 + $0xa8] sm:$0xff]  ;;  %v346_v57 = vld [vmem:[%s3438_s14 + $0xe0] sm:$0xff] }
  0xc8   : > { %2438 = vmatpush3.bf16.msra.mxu1 %v2554_v20  ;;  %v343_v56 = vld [vmem:[%s3438_s14 + $0xc8] sm:$0xff]  ;;  %v386_v58 = vld [vmem:[%s3438_s14 + $0x220] sm:$0xff]  ;;  %v389_v59 = vld [vmem:[%s3438_s14 + $0x238] sm:$0xff]  ;;  %v423_v60 = vpack.c.bf16 %v339_v55, %v336_v54 }
  0xc9   : > { %2431 = vmatprep.subr.bf16.mxu1 %v2555_v26  ;;  %v392_v61 = vld [vmem:[%s3438_s14 + $0x250] sm:$0xff]  ;;  %v395_v62 = vld [vmem:[%s3438_s14 + $0x268] sm:$0xff]  ;;  %v427_v63 = vpack.c.bf16 %v346_v57, %v343_v56  ;;  %v449_v0 = vpack.c.bf16 %v389_v59, %v386_v58  ;;  %v342_v1 = vld [vmem:[%s3438_s14 + $0xc0] sm:$0xff] }
  0xca   : > { %2253 = vmatpush3.bf16.msra.mxu0 %v2545_v9  ;;  %v345_v2 = vld [vmem:[%s3438_s14 + $0xd8] sm:$0xff]  ;;  %v452_v3 = vpack.c.bf16 %v395_v62, %v392_v61  ;;  %v352_v5 = vld [vmem:[%s3438_s14 + $0x110] sm:$0xff]  ;;  %v398_v6 = vld [vmem:[%s3438_s14 + $0x280] sm:$0xff] }
  0xcb   : > { %2254 = vmatprep.subr.bf16.mxu0 %v2546_v10  ;;  %v349_v4 = vld [vmem:[%s3438_s14 + $0xf8] sm:$0xff]  ;;  %v426_v8 = vpack.c.bf16 %v345_v2, %v342_v1  ;;  %v404_v9 = vld [vmem:[%s3438_s14 + $0x2b0] sm:$0xff]  ;;  %v407_v10 = vld [vmem:[%s3438_s14 + $0x2c8] sm:$0xff] }
  0xcc   : > { %2439 = vmatpush3.bf16.msra.mxu1 %v2555_v26  ;;  %v401_v7 = vld [vmem:[%s3438_s14 + $0x298] sm:$0xff]  ;;  %v430_v11 = vpack.c.bf16 %v352_v5, %v349_v4  ;;  %v458_v13 = vpack.c.bf16 %v407_v10, %v404_v9  ;;  %v354_v23 = vld [vmem:[%s3438_s14 + $0x120] sm:$0xff]  ;;  %v363_v30 = vld [vmem:[%s3438_s14 + $0x168] sm:$0xff] }
  0xcd   : > { %2432 = vmatprep.subr.bf16.mxu1 %v2556_v28  ;;  %v455_v12 = vpack.c.bf16 %v401_v7, %v398_v6  ;;  %v357_v24 = vld [vmem:[%s3438_s14 + $0x138] sm:$0xff]  ;;  %v367_v31 = vld [vmem:[%s3438_s14 + $0x188] sm:$0xff]  ;;  %v366_v35 = vld [vmem:[%s3438_s14 + $0x180] sm:$0xff] }
  0xce   : > { %2255 = vmatpush3.bf16.msra.mxu0 %v2547_v15  ;;  %v351_v15 = vld [vmem:[%s3438_s14 + $0x108] sm:$0xff]  ;;  %v361_v25 = vld [vmem:[%s3438_s14 + $0x158] sm:$0xff]  ;;  %v382_v44 = vld [vmem:[%s3438_s14 + $0x200] sm:$0xff] }
  0xcf   : > { %2256 = vmatprep.subr.bf16.mxu0 %v2548_v16  ;;  %v355_v16 = vld [vmem:[%s3438_s14 + $0x128] sm:$0xff]  ;;  %v369_v36 = vld [vmem:[%s3438_s14 + $0x198] sm:$0xff]  ;;  %v378_v47 = vld [vmem:[%s3438_s14 + $0x1e0] sm:$0xff] }
  0xd0   : > { %2440 = vmatpush3.bf16.msra.mxu1 %v2556_v28  ;;  %v373_v37 = vld [vmem:[%s3438_s14 + $0x1b8] sm:$0xff]  ;;  %v375_v42 = vld [vmem:[%s3438_s14 + $0x1c8] sm:$0xff]  ;;  %v388_v50 = vld [vmem:[%s3438_s14 + $0x230] sm:$0xff] }
  0xd1   : > { %2433 = vmatprep.subr.bf16.mxu1 %v2557_v32  ;;  %v379_v43 = vld [vmem:[%s3438_s14 + $0x1e8] sm:$0xff]  ;;  %v385_v49 = vld [vmem:[%s3438_s14 + $0x218] sm:$0xff]  ;;  %v394_v56 = vld [vmem:[%s3438_s14 + $0x260] sm:$0xff] }
  0xd2   : > { %2257 = vmatpush3.bf16.msra.mxu0 %v2549_v18  ;;  %v410_v18 = vld [vmem:[%s3438_s14 + $0x2e0] sm:$0xff]  ;;  %v445_v46 = vpack.c.bf16 %v382_v44, %v379_v43  ;;  %v387_v54 = vld [vmem:[%s3438_s14 + $0x228] sm:$0xff]  ;;  %v397_v61 = vld [vmem:[%s3438_s14 + $0x278] sm:$0xff] }
  0xd3   : > { %2258 = vmatprep.subr.bf16.mxu0 %v2550_v19  ;;  %v413_v19 = vld [vmem:[%s3438_s14 + $0x2f8] sm:$0xff]  ;;  %v391_v55 = vld [vmem:[%s3438_s14 + $0x248] sm:$0xff]  ;;  %v390_v59 = vld [vmem:[%s3438_s14 + $0x240] sm:$0xff] }
  0xd4   : > { %2441 = vmatpush3.bf16.msra.mxu1 %v2557_v32  ;;  %v461_v22 = vpack.c.bf16 %v413_v19, %v410_v18  ;;  %v451_v58 = vpack.c.bf16 %v394_v56, %v391_v55  ;;  %v400_v62 = vld [vmem:[%s3438_s14 + $0x290] sm:$0xff]  ;;  %v399_v2 = vld [vmem:[%s3438_s14 + $0x288] sm:$0xff]  ;;  %v406_v4 = vld [vmem:[%s3438_s14 + $0x2c0] sm:$0xff] }
  0xd5   : > { %2434 = vmatprep.subr.bf16.mxu1 %v2558_v39  ;;  %v396_v1 = vld [vmem:[%s3438_s14 + $0x270] sm:$0xff]  ;;  %v402_v7 = vld [vmem:[%s3438_s14 + $0x2a0] sm:$0xff]  ;;  %v409_v9 = vld [vmem:[%s3438_s14 + $0x2d8] sm:$0xff] }
  0xd6   : > { %2259 = vmatpush3.bf16.msra.mxu0 %v2551_v21  ;;  %v453_v5 = vpack.c.bf16 %v399_v2, %v396_v1  ;;  %v412_v10 = vld [vmem:[%s3438_s14 + $0x2f0] sm:$0xff]  ;;  %v326_v19 = vld [vmem:[%s3438_s14 + $0x40] sm:$0xff] }
  0xd7   : > { %2380 = vmatprep.subr.bf16.mxu0 %v2552_v14  ;;  %v2566_v56 = vld [vmem:[#allocation8 + $0x20] ss:$8 sps:$4 sm:$0xff]  }
  0xd8   : > { %2442 = vmatpush3.bf16.msra.mxu1 %v2558_v39 }
  0xd9   : > { %694 = vmatmul.mubr.bf16.vlgmr.msra.gmra.mrb[0].mxu0 %v414_v27  ;;  %2435 = vmatprep.subr.bf16.mxu1 %v2559_v41  ;;  %v432_v27 = vpack.c.bf16 %v357_v24, %v354_v23 }
  0xda   : > { %2381 = vmatpush3.bf16.msra.mxu0 %v2552_v14  ;;  %701 = vmatprep.mubr.bf16.mxu0 %v418_v29  ;;  %v348_v14 = vld [vmem:[%s3438_s14 + $0xf0] sm:$0xff] }
  0xdb   : > { %2382 = vmatprep.subr.bf16.mxu0 %v2553_v17  ;;  %v360_v29 = vld [vmem:[%s3438_s14 + $0x150] sm:$0xff] }
  0xdc   : > { %2443 = vmatpush3.bf16.msra.mxu1 %v2559_v41  ;;  %v435_v33 = vpack.c.bf16 %v363_v30, %v360_v29 }
  0xde   : > { %2383 = vmatpush3.bf16.msra.mxu0 %v2553_v17  ;;  %v358_v17 = vld [vmem:[%s3438_s14 + $0x140] sm:$0xff] }
  0xdf   : > { %2384 = vmatprep.subr.bf16.mxu0 %v2554_v20  ;;  %2413 = vmatmul.mubr.bf16.vlgmr.msra.gmra.mrb[0].mxu1 %v443_v52  ;;  %v433_v21 = vpack.c.bf16 %v358_v17, %v355_v16  ;;  %v448_v52 = vpack.c.bf16 %v388_v50, %v385_v49  ;;  %v323_v16 = vld [vmem:[%s3438_s14 + $0x28] sm:$0xff]  ;;  %v2563_v49 = vld [vmem:[#allocation8 + $0x10] ss:$8 sps:$4 sm:$0xff]  }
  0xe0   : > { %2416 = vmatprep.mubr.bf16.mxu1 %v446_v53  ;;  %v384_v53 = vld [vmem:[%s3438_s14 + $0x210] sm:$0xff] }
  0xe1   : > { %702 = vmatmul.mubr.bf16.gmra.mrb[4].mxu0 %v417_v38  ;;  %v376_v38 = vld [vmem:[%s3438_s14 + $0x1d0] sm:$0xff]  ;;  %v447_v57 = vpack.c.bf16 %v387_v54, %v384_v53 }
  0xe2   : > { %709 = vmatprep.mubr.bf16.mxu0 %v421_v40  ;;  %2385 = vmatpush3.bf16.msra.mxu0 %v2554_v20  ;;  %v429_v20 = vpack.c.bf16 %v351_v15, %v348_v14  ;;  %v442_v40 = vpack.c.bf16 %v376_v38, %v373_v37  ;;  %v411_v14 = vld [vmem:[%s3438_s14 + $0x2e8] sm:$0xff]  ;;  %v320_v15 = vld [vmem:[%s3438_s14 + $0x10] sm:$0xff]  ;;  %v362_v37 = vld [vmem:[%s3438_s14 + $0x160] sm:$0xff] }
  0xe3   : > { %2386 = vmatprep.subr.bf16.mxu0 %v2555_v26  ;;  %v416_v18 = vpack.c.bf16 %v323_v16, %v320_v15  ;;  %v365_v38 = vld [vmem:[%s3438_s14 + $0x178] sm:$0xff]  ;;  %v2568_v54 = vld [vmem:[#allocation8 + $0x24] ss:$8 sps:$4 sm:$0xff]  }
  0xe6   : > { %2387 = vmatpush3.bf16.msra.mxu0 %v2555_v26  ;;  %v364_v26 = vld [vmem:[%s3438_s14 + $0x170] sm:$0xff] }
  0xe7   : > { %2388 = vmatprep.subr.bf16.mxu0 %v2556_v28  ;;  %2417 = vmatmul.mubr.bf16.gmra.mrb[4].mxu1 %v449_v0  ;;  %v454_v0 = vpack.c.bf16 %v400_v62, %v397_v61  ;;  %v2569_v61 = vld [vmem:[#allocation8 + $0x30] ss:$8 sps:$4 sm:$0xff]  }
  0xe8   : > { %2420 = vmatprep.mubr.bf16.mxu1 %v452_v3  ;;  %v403_v3 = vld [vmem:[%s3438_s14 + $0x2a8] sm:$0xff] }
  0xe9   : > { %710 = vmatmul.mubr.bf16.gmra.mrb[8].mxu0 %v420_v48  ;;  %v381_v48 = vld [vmem:[%s3438_s14 + $0x1f8] sm:$0xff]  ;;  %v457_v6 = vpack.c.bf16 %v406_v4, %v403_v3 }
  0xea   : > { %717 = vmatprep.mubr.bf16.mxu0 %v424_v51  ;;  %2389 = vmatpush3.bf16.msra.mxu0 %v2556_v28  ;;  %v436_v28 = vpack.c.bf16 %v364_v26, %v361_v25  ;;  %v444_v51 = vpack.c.bf16 %v381_v48, %v378_v47  ;;  %v338_v25 = vld [vmem:[%s3438_s14 + $0xa0] sm:$0xff]  ;;  %v341_v26 = vld [vmem:[%s3438_s14 + $0xb8] sm:$0xff] }
  0xeb   : > { %2390 = vmatprep.subr.bf16.mxu0 %v2557_v32  ;;  %v425_v29 = vpack.c.bf16 %v341_v26, %v338_v25  ;;  %v2565_v48 = vld [vmem:[#allocation8 + $0x14] ss:$8 sps:$4 sm:$0xff]   ;;  %v2581_v25 = vld [vmem:[#allocation8 + $0x70] ss:$8 sps:$4 sm:$0xff]  }
  0xee   : > { %2391 = vmatpush3.bf16.msra.mxu0 %v2557_v32  ;;  %v370_v32 = vld [vmem:[%s3438_s14 + $0x1a0] sm:$0xff] }
  0xef   : > { %2392 = vmatprep.subr.bf16.mxu0 %v2558_v39  ;;  %2421 = vmatmul.mubr.bf16.gmra.mrb[8].mxu1 %v455_v12  ;;  %v439_v34 = vpack.c.bf16 %v370_v32, %v367_v31  ;;  %v460_v12 = vpack.c.bf16 %v412_v10, %v409_v9  ;;  %v350_v31 = vld [vmem:[%s3438_s14 + $0x100] sm:$0xff]  ;;  %v353_v32 = vld [vmem:[%s3438_s14 + $0x118] sm:$0xff] }
  0xf0   : > { %2424 = vmatprep.mubr.bf16.mxu1 %v458_v13  ;;  %v408_v13 = vld [vmem:[%s3438_s14 + $0x2d0] sm:$0xff] }
  0xf1   : > { %718 = vmatmul.mubr.bf16.gmra.mrb[12].mxu0 %v423_v60  ;;  %v393_v60 = vld [vmem:[%s3438_s14 + $0x258] sm:$0xff]  ;;  %v459_v17 = vpack.c.bf16 %v411_v14, %v408_v13 }
  0xf2   : > { %725 = vmatprep.mubr.bf16.mxu0 %v427_v63  ;;  %2393 = vmatpush3.bf16.msra.mxu0 %v2558_v39  ;;  %v438_v39 = vpack.c.bf16 %v369_v36, %v366_v35  ;;  %v450_v63 = vpack.c.bf16 %v393_v60, %v390_v59  ;;  %v431_v35 = vpack.c.bf16 %v353_v32, %v350_v31  ;;  %v2571_v59 = vld [vmem:[#allocation8 + $0x34] ss:$8 sps:$4 sm:$0xff]  }
  0xf3   : > { %2394 = vmatprep.subr.bf16.mxu0 %v2559_v41  ;;  %v2577_v9 = vld [vmem:[#allocation8 + $0x54] ss:$8 sps:$4 sm:$0xff]  }
  0xf6   : > { %2395 = vmatpush3.bf16.msra.mxu0 %v2559_v41  ;;  %v372_v41 = vld [vmem:[%s3438_s14 + $0x1b0] sm:$0xff] }
  0xf7   : > { %2425 = vmatmul.mubr.bf16.gmra.mrb[12].mxu1 %v461_v22  ;;  %v441_v45 = vpack.c.bf16 %v375_v42, %v372_v41  ;;  %v335_v22 = vld [vmem:[%s3438_s14 + $0x88] sm:$0xff] }
  0xf8   : > { %v2562_v42 = vld [vmem:[#allocation8 + $0x4] ss:$8 sps:$4 sm:$0xff]  }
  0xf9   : > { %726 = vmatmul.mubr.bf16.gmra.mrb[16].mxu0 %v426_v8  ;;  %v405_v8 = vld [vmem:[%s3438_s14 + $0x2b8] sm:$0xff]  ;;  %1299 = vmatprep.subr.bf16.mxu1 %v2562_v42 }
  0xfa   : > { %733 = vmatprep.mubr.bf16.mxu0 %v430_v11  ;;  %v456_v11 = vpack.c.bf16 %v405_v8, %v402_v7  ;;  %v2572_v7 = vld [vmem:[#allocation8 + $0x40] ss:$8 sps:$4 sm:$0xff]  }
 0x101   : > { %734 = vmatmul.mubr.bf16.gmra.mrb[20].mxu0 %v429_v20  ;;  %v329_v20 = vld [vmem:[%s3438_s14 + $0x58] sm:$0xff] }
 0x102   : > { %741 = vmatprep.mubr.bf16.mxu0 %v433_v21  ;;  %v332_v21 = vld [vmem:[%s3438_s14 + $0x70] sm:$0xff]  ;;  %v419_v23 = vpack.c.bf16 %v329_v20, %v326_v19 }
 0x103   : > { %v422_v24 = vpack.c.bf16 %v335_v22, %v332_v21  ;;  %v2580_v19 = vld [vmem:[#allocation8 + $0x64] ss:$8 sps:$4 sm:$0xff]   ;;  %v2578_v21 = vld [vmem:[#allocation8 + $0x60] ss:$8 sps:$4 sm:$0xff]  }
 0x109   : > { %742 = vmatmul.mubr.bf16.gmra.mrb[24].mxu0 %v432_v27  ;;  %v344_v27 = vld [vmem:[%s3438_s14 + $0xd0] sm:$0xff] }
 0x10a   : > { %749 = vmatprep.mubr.bf16.mxu0 %v436_v28  ;;  %v347_v28 = vld [vmem:[%s3438_s14 + $0xe8] sm:$0xff] }
 0x10b   : > { %v428_v30 = vpack.c.bf16 %v347_v28, %v344_v27 }
 0x111   : > { %750 = vmatmul.mubr.bf16.gmra.mrb[28].mxu0 %v435_v33  ;;  %v356_v33 = vld [vmem:[%s3438_s14 + $0x130] sm:$0xff] }
 0x112   : > { %757 = vmatprep.mubr.bf16.mxu0 %v439_v34  ;;  %v359_v34 = vld [vmem:[%s3438_s14 + $0x148] sm:$0xff] }
 0x113   : > { %v434_v36 = vpack.c.bf16 %v359_v34, %v356_v33  ;;  %v3195_v34 = vmov 0  }
 0x114   : > { %1331 = vmatprep.mubr.bf16.mxu1 %v3195_v34 }
 0x119   : > { %758 = vmatmul.mubr.bf16.gmra.mrb[32].mxu0 %v438_v39  ;;  %v437_v39 = vpack.c.bf16 %v365_v38, %v362_v37 }
 0x11a   : > { %765 = vmatprep.mubr.bf16.mxu0 %v442_v40 }
 0x121   : > { %766 = vmatmul.mubr.bf16.gmra.mrb[36].mxu0 %v441_v45  ;;  %v2560_v45 = vld [vmem:[#allocation8] ss:$8 sps:$4 sm:$0xff]  }
 0x122   : > { %773 = vmatprep.mubr.bf16.mxu0 %v445_v46  ;;  %1300 = vmatpush1.bf16.msra.mxu1 %v2560_v45 }
 0x123   : > { %1301 = vmatprep.subr.bf16.mxu1 %v2565_v48 }
 0x126   : > { %1302 = vmatpush1.bf16.msra.mxu1 %v2563_v49 }
 0x127   : > { %1303 = vmatprep.subr.bf16.mxu1 %v2568_v54 }
 0x129   : > { %774 = vmatmul.mubr.bf16.gmra.mrb[40].mxu0 %v444_v51 }
 0x12a   : > { %781 = vmatprep.mubr.bf16.mxu0 %v448_v52  ;;  %1304 = vmatpush1.bf16.msra.mxu1 %v2566_v56 }
 0x12b   : > { %1305 = vmatprep.subr.bf16.mxu1 %v2571_v59 }
 0x12e   : > { %1306 = vmatpush1.bf16.msra.mxu1 %v2569_v61 }
 0x131   : > { %782 = vmatmul.mubr.bf16.gmra.mrb[44].mxu0 %v447_v57 }
 0x132   : > { %789 = vmatprep.mubr.bf16.mxu0 %v451_v58 }
 0x139   : > { %790 = vmatmul.mubr.bf16.gmra.mrb[48].mxu0 %v450_v63 }
 0x13a   : > { %797 = vmatprep.mubr.bf16.mxu0 %v454_v0 }
 0x141   : > { %798 = vmatmul.mubr.bf16.gmra.mrb[52].mxu0 %v453_v5  ;;  %v2574_v5 = vld [vmem:[#allocation8 + $0x44] ss:$8 sps:$4 sm:$0xff]  }
 0x142   : > { %805 = vmatprep.mubr.bf16.mxu0 %v457_v6  ;;  %1307 = vmatprep.subr.bf16.mxu1 %v2574_v5 }
 0x143   : > { %1308 = vmatpush1.bf16.msra.mxu1 %v2572_v7 }
 0x144   : > { %1309 = vmatprep.subr.bf16.mxu1 %v2577_v9 }
 0x149   : > { %806 = vmatmul.mubr.bf16.gmra.mrb[56].mxu0 %v456_v11  ;;  %v2575_v11 = vld [vmem:[#allocation8 + $0x50] ss:$8 sps:$4 sm:$0xff]  }
 0x14a   : > { %813 = vmatprep.mubr.bf16.mxu0 %v460_v12  ;;  %1310 = vmatpush1.bf16.msra.mxu1 %v2575_v11 }
 0x14b   : > { %1311 = vmatprep.subr.bf16.mxu1 %v2580_v19 }
 0x14e   : > { %1312 = vmatpush1.bf16.msra.mxu1 %v2578_v21 }
 0x151   : > { %814 = vmatmul.mubr.bf16.gmra.mrb[60].mxu0 %v459_v17 }
 0x152   : > { %2396 = vmatprep.mubr.bf16.mxu0 %v416_v18 }
 0x159   : > { %2397 = vmatmul.mubr.bf16.vlgmr.msra.gmra.mrb[64].mxu0 %v419_v23  ;;  %v2583_v23 = vld [vmem:[#allocation8 + $0x74] ss:$8 sps:$4 sm:$0xff]  }
 0x15a   : > { %2400 = vmatprep.mubr.bf16.mxu0 %v422_v24  ;;  %1313 = vmatprep.subr.bf16.mxu1 %v2583_v23 }
 0x15b   : > { %1314 = vmatpush1.bf16.msra.mxu1 %v2581_v25 }
 0x161   : > { %2401 = vmatmul.mubr.bf16.gmra.mrb[68].mxu0 %v425_v29 }
 0x162   : > { %2404 = vmatprep.mubr.bf16.mxu0 %v428_v30 }
 0x169   : > { %2405 = vmatmul.mubr.bf16.gmra.mrb[72].mxu0 %v431_v35 }
 0x16a   : > { %2408 = vmatprep.mubr.bf16.mxu0 %v434_v36 }
 0x171   : > { %2409 = vmatmul.mubr.bf16.gmra.mrb[76].mxu0 %v437_v39 }
 0x1ac   : > { %v2260_v40 = vpop.f32.mrb[0].mxu0 }
 0x1ad   : > { %v2261_v41 = vpop.f32.mrb[1].mxu0 }
 0x1ae   : > { %v3548_v43 = vadd.f32 %v2261_v41, %v2260_v40  ;;  %v2263_v44 = vpop.f32.mrb[2].mxu0 }
 0x1af   : > { %v2264_v46 = vpop.f32.mrb[3].mxu0 }
 0x1b0   : > { %v3550_v47 = vadd.f32 %v2264_v46, %v2263_v44 }
 0x1b2   : > { %v3558_v0 = vpop.f32.mrb[0].mxu1 }
 0x1b3   : > { %v3560_v2 = vpop.f32.mrb[1].mxu1 }
 0x1b4   : > { %v2266_v50 = vpop.f32.mrb[4].mxu0  ;;  %v3564_v4 = vpop.f32.mrb[2].mxu1 }
 0x1b5   : > { %v2267_v51 = vpop.f32.mrb[5].mxu0  ;;  %v3566_v6 = vpop.f32.mrb[3].mxu1 }
 0x1b6   : > { %v3552_v52 = vadd.f32 %v2267_v51, %v2266_v50  ;;  %v2269_v53 = vpop.f32.mrb[6].mxu0 }
 0x1b7   : > { %v2270_v55 = vpop.f32.mrb[7].mxu0 }
 0x1b8   : > { %v3554_v57 = vadd.f32 %v2270_v55, %v2269_v53 }
 0x1ba   : > { %v3570_v14 = vpop.f32.mrb[4].mxu1 }
 0x1bb   : > { %v3572_v16 = vpop.f32.mrb[5].mxu1 }
 0x1bc   : > { %v2272_v58 = vpop.f32.mrb[8].mxu0  ;;  %v3576_v18 = vpop.f32.mrb[6].mxu1 }
 0x1bd   : > { %v2273_v60 = vpop.f32.mrb[9].mxu0  ;;  %v3578_v20 = vpop.f32.mrb[7].mxu1 }
 0x1be   : > { %v3556_v62 = vadd.f32 %v2273_v60, %v2272_v58  ;;  %v2275_v63 = vpop.f32.mrb[10].mxu0 }
 0x1bf   : > { %v2276_v1 = vpop.f32.mrb[11].mxu0 }
 0x1c0   : > { %v3562_v3 = vadd.f32 %v2276_v1, %v2275_v63 }
 0x1c2   : > { %v3582_v28 = vpop.f32.mrb[8].mxu1 }
 0x1c3   : > { %v3584_v30 = vpop.f32.mrb[9].mxu1 }
 0x1c4   : > { %v2278_v8 = vpop.f32.mrb[12].mxu0  ;;  %v3588_v32 = vpop.f32.mrb[10].mxu1 }
 0x1c5   : > { %v2279_v10 = vpop.f32.mrb[13].mxu0  ;;  %v3590_v33 = vpop.f32.mrb[11].mxu1 }
 0x1c6   : > { %v3568_v12 = vadd.f32 %v2279_v10, %v2278_v8  ;;  %v2281_v13 = vpop.f32.mrb[14].mxu0  ;;  %v3613_v8 = vld [vmem:[#allocation7] ss:$0 sm:$0xff] }
 0x1c7   : > { %v2282_v15 = vpop.f32.mrb[15].mxu0 }
 0x1c8   : > { %v3574_v17 = vadd.f32 %v2282_v15, %v2281_v13 }
 0x1ca   : > { %v3595_v39 = vpop.f32.mrb[12].mxu1 }
 0x1cb   : > { %v3597_v41 = vpop.f32.mrb[13].mxu1 }
 0x1cc   : > { %v2284_v22 = vpop.f32.mrb[16].mxu0  ;;  %v3601_v44 = vpop.f32.mrb[14].mxu1 }
 0x1cd   : > { %v2285_v24 = vpop.f32.mrb[17].mxu0  ;;  %v3603_v45 = vpop.f32.mrb[15].mxu1 }
 0x1ce   : > { %v3580_v26 = vadd.f32 %v2285_v24, %v2284_v22  ;;  %v2287_v27 = vpop.f32.mrb[18].mxu0 }
 0x1cf   : > { %v2288_v29 = vpop.f32.mrb[19].mxu0 }
 0x1d0   : > { %v3586_v31 = vadd.f32 %v2288_v29, %v2287_v27 }
 0x1d4   : > { %v2290_v35 = vpop.f32.mrb[20].mxu0 }
 0x1d5   : > { %v2291_v36 = vpop.f32.mrb[21].mxu0 }
 0x1d6   : > { %v3593_v37 = vadd.f32 %v2291_v36, %v2290_v35  ;;  %v2293_v38 = vpop.f32.mrb[22].mxu0 }
 0x1d7   : > { %v2294_v40 = vpop.f32.mrb[23].mxu0 }
 0x1d8   : > { %v3599_v42 = vadd.f32 %v2294_v40, %v2293_v38 }
 0x1dc   : > { %v2296_v46 = vpop.f32.mrb[24].mxu0 }
 0x1dd   : > { %v2297_v48 = vpop.f32.mrb[25].mxu0 }
 0x1de   : > { %v3605_v49 = vadd.f32 %v2297_v48, %v2296_v46  ;;  %v2299_v50 = vpop.f32.mrb[26].mxu0 }
 0x1df   : > { %v2300_v51 = vpop.f32.mrb[27].mxu0 }
 0x1e0   : > { %v3607_v53 = vadd.f32 %v2300_v51, %v2299_v50 }
 0x1e4   : > { %v2302_v54 = vpop.f32.mrb[28].mxu0 }
 0x1e5   : > { %v2303_v55 = vpop.f32.mrb[29].mxu0 }
 0x1e6   : > { %v3609_v56 = vadd.f32 %v2303_v55, %v2302_v54  ;;  %v2305_v58 = vpop.f32.mrb[30].mxu0 }
 0x1e7   : > { %v2306_v59 = vpop.f32.mrb[31].mxu0 }
 0x1e8   : > { %v3611_v60 = vadd.f32 %v2306_v59, %v2305_v58 }
 0x1ec   : > { %v2308_v61 = vpop.f32.mrb[32].mxu0 }
 0x1ed   : > { %v2309_v63 = vpop.f32.mrb[33].mxu0 }
 0x1ee   : > { %v2310_v1 = vadd.f32 %v2309_v63, %v2308_v61  ;;  %v2311_v5 = vpop.f32.mrb[34].mxu0 }
 0x1ef   : > { %v2312_v7 = vpop.f32.mrb[35].mxu0 }
 0x1f0   : > { %v2313_v9 = vadd.f32 %v2312_v7, %v2311_v5  ;;  %v760_v10 = vadd.f32 %v2310_v1, %v3613_v8 }
 0x1f2   : > { %v921_v11 = vadd.f32 %v3560_v2, %v760_v10  ;;  %v763_v13 = vadd.f32 %v2313_v9, %v3613_v8 }
 0x1f4   : > { %v2134_v15 = vmul.f32 -1.442695, %v921_v11  ;;  %v924_v19 = vadd.f32 %v3566_v6, %v763_v13  ;;  %v2314_v21 = vpop.f32.mrb[36].mxu0 }
 0x1f5   : > { %v2315_v22 = vpop.f32.mrb[37].mxu0 }
 0x1f6   : > { %2584 = vpow2.f32 %v2134_v15  ;;  %v2135_v23 = vmul.f32 -1.442695, %v924_v19  ;;  %v2316_v24 = vadd.f32 %v2315_v22, %v2314_v21  ;;  %v2317_v25 = vpop.f32.mrb[38].mxu0 }
 0x1f7   : > { %v2318_v27 = vpop.f32.mrb[39].mxu0 }
 0x1f8   : > { %2586 = vpow2.f32 %v2135_v23  ;;  %v768_v29 = vadd.f32 %v2316_v24, %v3613_v8  ;;  %v2319_v35 = vadd.f32 %v2318_v27, %v2317_v25 }
 0x1fa   : > { %v929_v36 = vadd.f32 %v3558_v0, %v768_v29  ;;  %v771_v2 = vadd.f32 %v2319_v35, %v3613_v8 }
 0x1fc   : > { %v2136_v38 = vmul.f32 -1.442695, %v929_v36  ;;  %v932_v40 = vadd.f32 %v3564_v4, %v771_v2  ;;  %v2320_v46 = vpop.f32.mrb[40].mxu0 }
 0x1fd   : > { %v2321_v6 = vpop.f32.mrb[41].mxu0 }
 0x1fe   : > { %2588 = vpow2.f32 %v2136_v38  ;;  %v2137_v48 = vmul.f32 -1.442695, %v932_v40  ;;  %v2322_v50 = vadd.f32 %v2321_v6, %v2320_v46  ;;  %v2323_v51 = vpop.f32.mrb[42].mxu0 }
 0x1ff   : > { %v2324_v54 = vpop.f32.mrb[43].mxu0 }
 0x200   : > { %v2585_v55 = vpop.eup %2584  ;;  %2590 = vpow2.f32 %v2137_v48  ;;  %v2325_v58 = vadd.f32 %v2324_v54, %v2323_v51  ;;  %v776_v59 = vadd.f32 %v2322_v50, %v3613_v8 }
 0x201   : > { %v1095_v61 = vadd.f32 1.0, %v2585_v55 }
 0x202   : > { %v2587_v63 = vpop.eup %2586  ;;  %v937_v0 = vadd.f32 %v3572_v16, %v776_v59  ;;  %v779_v1 = vadd.f32 %v2325_v58, %v3613_v8 }
 0x203   : > { %v1096_v5 = vadd.f32 1.0, %v2587_v63  ;;  %2592 = vrcp.f32 %v1095_v61 }
 0x204   : > { %v2138_v4 = vmul.f32 -1.442695, %v937_v0  ;;  %v940_v7 = vadd.f32 %v3578_v20, %v779_v1  ;;  %v2326_v9 = vpop.f32.mrb[44].mxu0 }
 0x205   : > { %2594 = vrcp.f32 %v1096_v5  ;;  %v2327_v10 = vpop.f32.mrb[45].mxu0 }
 0x206   : > { %2596 = vpow2.f32 %v2138_v4  ;;  %v2139_v11 = vmul.f32 -1.442695, %v940_v7  ;;  %v2328_v13 = vadd.f32 %v2327_v10, %v2326_v9  ;;  %v2329_v15 = vpop.f32.mrb[46].mxu0 }
 0x207   : > { %v2330_v19 = vpop.f32.mrb[47].mxu0 }
 0x208   : > { %v2589_v21 = vpop.eup %2588  ;;  %2598 = vpow2.f32 %v2139_v11  ;;  %v784_v22 = vadd.f32 %v2328_v13, %v3613_v8  ;;  %v2331_v16 = vadd.f32 %v2330_v19, %v2329_v15 }
 0x209   : > { %v1097_v23 = vadd.f32 1.0, %v2589_v21 }
 0x20a   : > { %v2591_v24 = vpop.eup %2590  ;;  %v945_v25 = vadd.f32 %v3570_v14, %v784_v22  ;;  %v787_v27 = vadd.f32 %v2331_v16, %v3613_v8 }
 0x20b   : > { %v1098_v20 = vadd.f32 1.0, %v2591_v24  ;;  %2600 = vrcp.f32 %v1097_v23 }
 0x20c   : > { %v2140_v29 = vmul.f32 -1.442695, %v945_v25  ;;  %v948_v35 = vadd.f32 %v3576_v18, %v787_v27  ;;  %v2332_v36 = vpop.f32.mrb[48].mxu0 }
 0x20d   : > { %2602 = vrcp.f32 %v1098_v20  ;;  %v2333_v2 = vpop.f32.mrb[49].mxu0  ;;  %v3631_v38 = vpop.eup %2592 }
 0x20e   : > { %2604 = vpow2.f32 %v2140_v29  ;;  %v2141_v40 = vmul.f32 -1.442695, %v948_v35  ;;  %v2334_v46 = vadd.f32 %v2333_v2, %v2332_v36  ;;  %v2335_v6 = vpop.f32.mrb[50].mxu0 }
 0x20f   : > { %v3633_v48 = vpop.eup %2594  ;;  %v2336_v50 = vpop.f32.mrb[51].mxu0 }
 0x210   : > { %v2597_v14 = vpop.eup %2596  ;;  %2606 = vpow2.f32 %v2141_v40  ;;  %v2337_v51 = vadd.f32 %v2336_v50, %v2335_v6  ;;  %v792_v54 = vadd.f32 %v2334_v46, %v3613_v8  ;;  %v1183_v18 = vpack.c.bf16 %v3633_v48, %v3631_v38 }
 0x211   : > { %v1099_v55 = vadd.f32 1.0, %v2597_v14  ;;  %v1209_v38 = vlaneseq }
 0x212   : > { %v2599_v58 = vpop.eup %2598  ;;  %v953_v59 = vadd.f32 %v3584_v30, %v792_v54  ;;  %v795_v61 = vadd.f32 %v2337_v51, %v3613_v8 }
 0x213   : > { %v1100_v63 = vadd.f32 1.0, %v2599_v58  ;;  %2608 = vrcp.f32 %v1099_v55  ;;  %v1210_v48 = vshrl.u32 %v1209_v38, 7 }
 0x214   : > { %v2142_v0 = vmul.f32 -1.442695, %v953_v59  ;;  %v956_v1 = vadd.f32 %v3590_v33, %v795_v61  ;;  %v2338_v5 = vpop.f32.mrb[52].mxu0 }
 0x215   : > { %2610 = vrcp.f32 %v1100_v63  ;;  %v2339_v4 = vpop.f32.mrb[53].mxu0  ;;  %v3641_v7 = vpop.eup %2600 }
 0x216   : > { %2612 = vpow2.f32 %v2142_v0  ;;  %v2143_v9 = vmul.f32 -1.442695, %v956_v1  ;;  %v2340_v10 = vadd.f32 %v2339_v4, %v2338_v5  ;;  %v2341_v11 = vpop.f32.mrb[54].mxu0 }
 0x217   : > { %v3643_v13 = vpop.eup %2602  ;;  %v2342_v15 = vpop.f32.mrb[55].mxu0 }
 0x218   : > { %v2605_v30 = vpop.eup %2604  ;;  %2614 = vpow2.f32 %v2143_v9  ;;  %v800_v19 = vadd.f32 %v2340_v10, %v3613_v8  ;;  %v2343_v21 = vadd.f32 %v2342_v15, %v2341_v11  ;;  %v1184_v33 = vpack.c.bf16 %v3643_v13, %v3641_v7  ;;  %v1207_v7 = vld [vmem:[#allocation10] sm:$0x3] }
 0x219   : > { %v1101_v22 = vadd.f32 1.0, %v2605_v30  ;;  %v1215_v13 = vsub.s32 1, %v1210_v48 }
 0x21a   : > { %v2607_v16 = vpop.eup %2606  ;;  %v961_v23 = vadd.f32 %v3582_v28, %v800_v19  ;;  %v803_v24 = vadd.f32 %v2343_v21, %v3613_v8 }
 0x21b   : > { %v1102_v25 = vadd.f32 1.0, %v2607_v16  ;;  %2616 = vrcp.f32 %v1101_v22 }
 0x21c   : > { %v2144_v27 = vmul.f32 -1.442695, %v961_v23  ;;  %v964_v20 = vadd.f32 %v3588_v32, %v803_v24  ;;  %v2344_v29 = vpop.f32.mrb[56].mxu0 }
 0x21d   : > { %2618 = vrcp.f32 %v1102_v25  ;;  %v2345_v35 = vpop.f32.mrb[57].mxu0  ;;  %v3651_v36 = vpop.eup %2608 }
 0x21e   : > { %2620 = vpow2.f32 %v2144_v27  ;;  %v2145_v2 = vmul.f32 -1.442695, %v964_v20  ;;  %v2346_v40 = vadd.f32 %v2345_v35, %v2344_v29  ;;  %v2347_v46 = vpop.f32.mrb[58].mxu0  ;;  %v704_v27 = vadd.f32 %v3552_v52, %v3613_v8 }
 0x21f   : > { %v3653_v6 = vpop.eup %2610  ;;  %v2348_v50 = vpop.f32.mrb[59].mxu0 }
 0x220   : > { %v2613_v28 = vpop.eup %2612  ;;  %2622 = vpow2.f32 %v2145_v2  ;;  %v2349_v14 = vadd.f32 %v2348_v50, %v2347_v46  ;;  %v808_v51 = vadd.f32 %v2346_v40, %v3613_v8  ;;  %v1185_v32 = vpack.c.bf16 %v3653_v6, %v3651_v36 }
 0x221   : > { %v1103_v54 = vadd.f32 1.0, %v2613_v28  ;;  %v696_v2 = vadd.f32 %v3548_v43, %v3613_v8  ;;  %v3768_v36 = vrot.slane %v1207_v7, %v1215_v13 }
 0x222   : > { %v2615_v55 = vpop.eup %2614  ;;  %v969_v58 = vadd.f32 %v3597_v41, %v808_v51  ;;  %v811_v59 = vadd.f32 %v2349_v14, %v3613_v8  ;;  %v699_v51 = vadd.f32 %v3550_v47, %v3613_v8 }
 0x223   : > { %v1104_v61 = vadd.f32 1.0, %v2615_v55  ;;  %2624 = vrcp.f32 %v1103_v54 }
 0x224   : > { %v2146_v63 = vmul.f32 -1.442695, %v969_v58  ;;  %v972_v0 = vadd.f32 %v3603_v45, %v811_v59  ;;  %v2350_v1 = vpop.f32.mrb[60].mxu0 }
 0x225   : > { %2626 = vrcp.f32 %v1104_v61  ;;  %v2351_v5 = vpop.f32.mrb[61].mxu0  ;;  %v3661_v4 = vpop.eup %2616 }
 0x226   : > { %2628 = vpow2.f32 %v2146_v63  ;;  %v2147_v9 = vmul.f32 -1.442695, %v972_v0  ;;  %v2352_v10 = vadd.f32 %v2351_v5, %v2350_v1  ;;  %v2353_v11 = vpop.f32.mrb[62].mxu0 }
 0x227   : > { %v3663_v15 = vpop.eup %2618  ;;  %v2354_v30 = vpop.f32.mrb[63].mxu0 }
 0x228   : > { %v2621_v41 = vpop.eup %2620  ;;  %2630 = vpow2.f32 %v2147_v9  ;;  %v816_v19 = vadd.f32 %v2352_v10, %v3613_v8  ;;  %v2355_v21 = vadd.f32 %v2354_v30, %v2353_v11  ;;  %v1186_v45 = vpack.c.bf16 %v3663_v15, %v3661_v4 }
 0x229   : > { %v1105_v22 = vadd.f32 1.0, %v2621_v41  ;;  %v720_v9 = vadd.f32 %v3568_v12, %v3613_v8  ;;  %v712_v11 = vadd.f32 %v3556_v62, %v3613_v8 }
 0x22a   : > { %v2623_v16 = vpop.eup %2622  ;;  %v977_v23 = vadd.f32 %v3595_v39, %v816_v19  ;;  %v819_v24 = vadd.f32 %v2355_v21, %v3613_v8  ;;  %v707_v39 = vadd.f32 %v3554_v57, %v3613_v8  ;;  %v723_v19 = vadd.f32 %v3574_v17, %v3613_v8 }
 0x22b   : > { %v1106_v25 = vadd.f32 1.0, %v2623_v16  ;;  %2632 = vrcp.f32 %v1105_v22 }
 0x22c   : > { %v2148_v20 = vmul.f32 -1.442695, %v977_v23  ;;  %v980_v29 = vadd.f32 %v3601_v44, %v819_v24  ;;  %v2398_v35 = vpop.f32.mrb[64].mxu0  ;;  %v715_v23 = vadd.f32 %v3562_v3, %v3613_v8  ;;  %v736_v3 = vadd.f32 %v3593_v37, %v3613_v8 }
 0x22d   : > { %2634 = vrcp.f32 %v1106_v25  ;;  %v865_v40 = vadd.f32 %v2398_v35, %v704_v27  ;;  %v856_v46 = vpop.f32.mrb[65].mxu0  ;;  %v3677_v50 = vpop.eup %2624 }
 0x22e   : > { %2636 = vpow2.f32 %v2148_v20  ;;  %v2149_v28 = vmul.f32 -1.442695, %v980_v29  ;;  %v857_v14 = vadd.f32 %v856_v46, %v696_v2  ;;  %v2399_v52 = vpop.f32.mrb[66].mxu0 }
 0x22f   : > { %v3681_v44 = vpop.eup %2626  ;;  %v2120_v54 = vmul.f32 -1.442695, %v865_v40  ;;  %v868_v55 = vadd.f32 %v2399_v52, %v707_v39  ;;  %v859_v43 = vpop.f32.mrb[67].mxu0 }
 0x230   : > { %v2629_v58 = vpop.eup %2628  ;;  %2638 = vpow2.f32 %v2149_v28  ;;  %v2118_v59 = vmul.f32 -1.442695, %v857_v14  ;;  %v860_v61 = vadd.f32 %v859_v43, %v699_v51  ;;  %v1187_v57 = vpack.c.bf16 %v3681_v44, %v3677_v50 }
 0x231   : > { %v1107_v63 = vadd.f32 1.0, %v2629_v58  ;;  %2640 = vpow2.f32 %v2120_v54  ;;  %v2121_v0 = vmul.f32 -1.442695, %v868_v55  ;;  %v728_v54 = vadd.f32 %v3580_v26, %v3613_v8 }
 0x232   : > { %v2631_v1 = vpop.eup %2630  ;;  %2642 = vpow2.f32 %v2118_v59  ;;  %v2119_v5 = vmul.f32 -1.442695, %v860_v61  ;;  %v739_v61 = vadd.f32 %v3599_v42, %v3613_v8 }
 0x233   : > { %2644 = vrcp.f32 %v1107_v63  ;;  %v1108_v47 = vadd.f32 1.0, %v2631_v1  ;;  %v731_v1 = vadd.f32 %v3586_v31, %v3613_v8  ;;  %v752_v31 = vadd.f32 %v3609_v56, %v3613_v8 }
 0x234   : > { %2646 = vpow2.f32 %v2121_v0  ;;  %v2402_v10 = vpop.f32.mrb[68].mxu0 }
 0x235   : > { %2648 = vrcp.f32 %v1108_v47  ;;  %v881_v30 = vadd.f32 %v2402_v10, %v720_v9  ;;  %v872_v41 = vpop.f32.mrb[69].mxu0  ;;  %v3691_v21 = vpop.eup %2632 }
 0x236   : > { %2650 = vpow2.f32 %v2119_v5  ;;  %v873_v22 = vadd.f32 %v872_v41, %v712_v11  ;;  %v2403_v16 = vpop.f32.mrb[70].mxu0 }
 0x237   : > { %v3695_v12 = vpop.eup %2634  ;;  %v2124_v24 = vmul.f32 -1.442695, %v881_v30  ;;  %v884_v25 = vadd.f32 %v2403_v16, %v723_v19  ;;  %v875_v27 = vpop.f32.mrb[71].mxu0 }
 0x238   : > { %v2637_v62 = vpop.eup %2636  ;;  %v2122_v20 = vmul.f32 -1.442695, %v873_v22  ;;  %v876_v29 = vadd.f32 %v875_v27, %v715_v23  ;;  %v1188_v35 = vpack.c.bf16 %v3695_v12, %v3691_v21 }
 0x239   : > { %v1109_v17 = vadd.f32 1.0, %v2637_v62  ;;  %2652 = vpow2.f32 %v2124_v24  ;;  %v2125_v2 = vmul.f32 -1.442695, %v884_v25  ;;  %v744_v62 = vadd.f32 %v3605_v49, %v3613_v8 }
 0x23a   : > { %v2639_v40 = vpop.eup %2638  ;;  %2654 = vpow2.f32 %v2122_v20  ;;  %v2123_v52 = vmul.f32 -1.442695, %v876_v29 }
 0x23b   : > { %v2641_v46 = vpop.eup %2640  ;;  %2656 = vrcp.f32 %v1109_v17  ;;  %v1110_v39 = vadd.f32 1.0, %v2639_v40  ;;  %v755_v40 = vadd.f32 %v3611_v60, %v3613_v8 }
 0x23c   : > { %v2643_v28 = vpop.eup %2642  ;;  %v1081_v14 = vadd.f32 1.0, %v2641_v46  ;;  %2658 = vpow2.f32 %v2125_v2  ;;  %v2406_v51 = vpop.f32.mrb[72].mxu0 }
 0x23d   : > { %v3703_v55 = vpop.eup %2644  ;;  %2660 = vrcp.f32 %v1110_v39  ;;  %v1079_v43 = vadd.f32 1.0, %v2643_v28  ;;  %v897_v58 = vadd.f32 %v2406_v51, %v736_v3  ;;  %v888_v59 = vpop.f32.mrb[73].mxu0  ;;  %v747_v3 = vadd.f32 %v3607_v53, %v3613_v8 }
 0x23e   : > { %v2647_v63 = vpop.eup %2646  ;;  %2662 = vrcp.f32 %v1081_v14  ;;  %v889_v37 = vadd.f32 %v888_v59, %v728_v54  ;;  %v2407_v0 = vpop.f32.mrb[74].mxu0 }
 0x23f   : > { %v3709_v5 = vpop.eup %2648  ;;  %2664 = vrcp.f32 %v1079_v43  ;;  %v1082_v26 = vadd.f32 1.0, %v2647_v63  ;;  %v2128_v47 = vmul.f32 -1.442695, %v897_v58  ;;  %v900_v9 = vadd.f32 %v2407_v0, %v739_v61  ;;  %v891_v10 = vpop.f32.mrb[75].mxu0 }
 0x240   : > { %v2651_v11 = vpop.eup %2650  ;;  %2666 = vpow2.f32 %v2123_v52  ;;  %v2126_v30 = vmul.f32 -1.442695, %v889_v37  ;;  %v892_v41 = vadd.f32 %v891_v10, %v731_v1  ;;  %v1189_v42 = vpack.c.bf16 %v3709_v5, %v3703_v55 }
 0x241   : > { %2668 = vrcp.f32 %v1082_v26  ;;  %v1080_v19 = vadd.f32 1.0, %v2651_v11  ;;  %v2129_v22 = vmul.f32 -1.442695, %v900_v9 }
 0x242   : > { %2670 = vpow2.f32 %v2128_v47  ;;  %v2127_v25 = vmul.f32 -1.442695, %v892_v41 }
 0x243   : > { %v2653_v16 = vpop.eup %2652  ;;  %2672 = vrcp.f32 %v1080_v19 }
 0x244   : > { %v2655_v23 = vpop.eup %2654  ;;  %v1085_v24 = vadd.f32 1.0, %v2653_v16  ;;  %2674 = vpow2.f32 %v2126_v30  ;;  %v2410_v27 = vpop.f32.mrb[76].mxu0 }
 0x245   : > { %v3717_v20 = vpop.eup %2656  ;;  %v1083_v29 = vadd.f32 1.0, %v2655_v23  ;;  %2676 = vpow2.f32 %v2129_v22  ;;  %v913_v17 = vadd.f32 %v2410_v27, %v752_v31  ;;  %v904_v2 = vpop.f32.mrb[77].mxu0 }
 0x246   : > { %v2659_v46 = vpop.eup %2658  ;;  %2678 = vrcp.f32 %v1085_v24  ;;  %v905_v56 = vadd.f32 %v904_v2, %v744_v62  ;;  %v2411_v39 = vpop.f32.mrb[78].mxu0 }
 0x247   : > { %v3723_v28 = vpop.eup %2660  ;;  %2680 = vrcp.f32 %v1083_v29  ;;  %v1086_v49 = vadd.f32 1.0, %v2659_v46  ;;  %v2132_v14 = vmul.f32 -1.442695, %v913_v17  ;;  %v916_v52 = vadd.f32 %v2411_v39, %v755_v40  ;;  %v907_v51 = vpop.f32.mrb[79].mxu0 }
 0x248   : > { %v2663_v54 = vpop.eup %2662  ;;  %2682 = vpow2.f32 %v2127_v25  ;;  %v2130_v43 = vmul.f32 -1.442695, %v905_v56  ;;  %v908_v58 = vadd.f32 %v907_v51, %v747_v3  ;;  %v1190_v60 = vpack.c.bf16 %v3723_v28, %v3717_v20 }
 0x249   : > { %v2665_v59 = vpop.eup %2664  ;;  %2684 = vrcp.f32 %v1086_v49  ;;  %v2133_v61 = vmul.f32 -1.442695, %v916_v52 }
 0x24a   : > { %v2667_v63 = vpop.eup %2666  ;;  %2686 = vpow2.f32 %v2132_v14  ;;  %v2131_v53 = vmul.f32 -1.442695, %v908_v58 }
 0x24b   : > { %v2669_v8 = vpop.eup %2668  ;;  %v1084_v37 = vadd.f32 1.0, %v2667_v63  ;;  %2688 = vpow2.f32 %v2130_v43 }
 0x24c   : > { %v2671_v0 = vpop.eup %2670  ;;  %2690 = vpow2.f32 %v2133_v61  ;;  %v1176_v1 = vpack.c.bf16 %v2669_v8, %v2663_v54 }
 0x24d   : > { %v2673_v26 = vpop.eup %2672  ;;  %2692 = vrcp.f32 %v1084_v37  ;;  %v1089_v47 = vadd.f32 1.0, %v2671_v0 }
 0x24e   : > { %v2675_v9 = vpop.eup %2674  ;;  %2694 = vpow2.f32 %v2131_v53  ;;  %v1175_v10 = vpack.c.bf16 %v2673_v26, %v2665_v59 }
 0x24f   : > { %v2677_v11 = vpop.eup %2676  ;;  %v1087_v41 = vadd.f32 1.0, %v2675_v9  ;;  %2696 = vrcp.f32 %v1089_v47 }
 0x250   : > { %v2679_v30 = vpop.eup %2678  ;;  %v1090_v19 = vadd.f32 1.0, %v2677_v11  ;;  %1332 = vmatmul.mubr.bf16.vlgmr.msra.gmra.mrb[16].mxu1 %v1175_v10 }
 0x251   : > { %v2681_v22 = vpop.eup %2680  ;;  %1341 = vmatprep.mubr.bf16.mxu1 %v3195_v34 }
 0x252   : > { %v2683_v16 = vpop.eup %2682  ;;  %2698 = vrcp.f32 %v1090_v19 }
 0x253   : > { %v2685_v31 = vpop.eup %2684  ;;  %v1088_v23 = vadd.f32 1.0, %v2683_v16  ;;  %2700 = vrcp.f32 %v1087_v41 }
 0x254   : > { %v2687_v24 = vpop.eup %2686  ;;  %v1178_v25 = vpack.c.bf16 %v2685_v31, %v2679_v30 }
 0x255   : > { %v2689_v27 = vpop.eup %2688  ;;  %2702 = vrcp.f32 %v1088_v23  ;;  %v1093_v62 = vadd.f32 1.0, %v2687_v24 }
 0x256   : > { %v2691_v29 = vpop.eup %2690  ;;  %v1091_v17 = vadd.f32 1.0, %v2689_v27 }
 0x257   : > { %v2693_v2 = vpop.eup %2692  ;;  %v1094_v40 = vadd.f32 1.0, %v2691_v29  ;;  %2704 = vrcp.f32 %v1093_v62 }
 0x258   : > { %v2695_v46 = vpop.eup %2694  ;;  %1342 = vmatmul.mubr.bf16.gmra.mrb[20].mxu1 %v1176_v1  ;;  %v1177_v56 = vpack.c.bf16 %v2693_v2, %v2681_v22 }
 0x259   : > { %2706 = vrcp.f32 %v1094_v40  ;;  %v1092_v39 = vadd.f32 1.0, %v2695_v46  ;;  %1351 = vmatprep.mubr.bf16.mxu1 %v3195_v34  ;;  %v2697_v3 = vpop.eup %2696 }
 0x25a   : > { %2708 = vrcp.f32 %v1091_v17 }
 0x25b   : > { %2710 = vrcp.f32 %v1092_v39 }
 0x25c   : > { %v2699_v49 = vpop.eup %2698 }
 0x25d   : > { %v1180_v14 = vpack.c.bf16 %v2699_v49, %v2697_v3  ;;  %v2701_v52 = vpop.eup %2700 }
 0x25f   : > { %v2703_v51 = vpop.eup %2702 }
 0x260   : > { %1352 = vmatmul.mubr.bf16.gmra.mrb[24].mxu1 %v1177_v56  ;;  %v1179_v54 = vpack.c.bf16 %v2703_v51, %v2701_v52 }
 0x261   : > { %1361 = vmatprep.mubr.bf16.mxu1 %v3195_v34  ;;  %v2705_v43 = vpop.eup %2704 }
 0x263   : > { %v2707_v58 = vpop.eup %2706 }
 0x264   : > { %v2709_v59 = vpop.eup %2708  ;;  %v1182_v61 = vpack.c.bf16 %v2707_v58, %v2705_v43 }
 0x265   : > { %v2711_v63 = vpop.eup %2710 }
 0x266   : > { %v1181_v53 = vpack.c.bf16 %v2711_v63, %v2709_v59 }
 0x268   : > { %1362 = vmatmul.mubr.bf16.gmra.mrb[28].mxu1 %v1178_v25 }
 0x269   : > { %1371 = vmatprep.mubr.bf16.mxu1 %v3195_v34 }
 0x270   : > { %1372 = vmatmul.mubr.bf16.gmra.mrb[32].mxu1 %v1179_v54 }
 0x271   : > { %1381 = vmatprep.mubr.bf16.mxu1 %v3195_v34 }
 0x278   : > { %1382 = vmatmul.mubr.bf16.gmra.mrb[36].mxu1 %v1180_v14 }
 0x279   : > { %1391 = vmatprep.mubr.bf16.mxu1 %v3195_v34 }
 0x280   : > { %1392 = vmatmul.mubr.bf16.gmra.mrb[40].mxu1 %v1181_v53 }
 0x281   : > { %1401 = vmatprep.mubr.bf16.mxu1 %v3195_v34 }
 0x288   : > { %1402 = vmatmul.mubr.bf16.gmra.mrb[44].mxu1 %v1182_v61 }
 0x289   : > { %1411 = vmatprep.mubr.bf16.mxu1 %v3195_v34 }
 0x290   : > { %1412 = vmatmul.mubr.bf16.gmra.mrb[48].mxu1 %v1183_v18  ;;  %v1211_v18 = vsub.s32 0, %v1210_v48 }
 0x291   : > { %1421 = vmatprep.mubr.bf16.mxu1 %v3195_v34 }
 0x298   : > { %1422 = vmatmul.mubr.bf16.gmra.mrb[52].mxu1 %v1184_v33  ;;  %v3766_v33 = vrot.slane %v1207_v7, %v1211_v18 }
 0x299   : > { %1431 = vmatprep.mubr.bf16.mxu1 %v3195_v34 }
 0x2a0   : > { %1432 = vmatmul.mubr.bf16.gmra.mrb[56].mxu1 %v1185_v32 }
 0x2a1   : > { %1441 = vmatprep.mubr.bf16.mxu1 %v3195_v34 }
 0x2a8   : > { %1442 = vmatmul.mubr.bf16.gmra.mrb[60].mxu1 %v1186_v45 }
 0x2a9   : > { %1451 = vmatprep.mubr.bf16.mxu1 %v3195_v34 }
 0x2b0   : > { %1452 = vmatmul.mubr.bf16.gmra.mrb[64].mxu1 %v1187_v57 }
 0x2b1   : > { %1461 = vmatprep.mubr.bf16.mxu1 %v3195_v34 }
 0x2b8   : > { %1462 = vmatmul.mubr.bf16.gmra.mrb[68].mxu1 %v1188_v35 }
 0x2b9   : > { %1471 = vmatprep.mubr.bf16.mxu1 %v3195_v34 }
 0x2c0   : > { %1472 = vmatmul.mubr.bf16.gmra.mrb[72].mxu1 %v1189_v42 }
 0x2c1   : > { %1481 = vmatprep.mubr.bf16.mxu1 %v3195_v34 }
 0x2c8   : > { %1482 = vmatmul.mubr.bf16.gmra.mrb[76].mxu1 %v1190_v60 }
 0x323   : > { %v1333_v6 = vpop.f32.mrb[16].mxu1 }
 0x324   : > { %v1334_v32 = vadd.f32 %v1333_v6, %v3766_v33  ;;  %v1335_v4 = vpop.f32.mrb[17].mxu1 }
 0x325   : > { %v1336_v15 = vadd.f32 %v1335_v4, %v3768_v36  ;;  %v1337_v34 = vpop.f32.mrb[18].mxu1 }
 0x326   : > { %v2166_v45 = vmul.f32 -1.442695, %v1334_v32  ;;  %v1338_v50 = vadd.f32 %v1337_v34, %v3766_v33  ;;  %v1339_v44 = vpop.f32.mrb[19].mxu1 }
 0x327   : > { %v2167_v57 = vmul.f32 -1.442695, %v1336_v15  ;;  %v1340_v21 = vadd.f32 %v1339_v44, %v3768_v36 }
 0x328   : > { %2712 = vpow2.f32 %v2166_v45  ;;  %v2168_v12 = vmul.f32 -1.442695, %v1338_v50 }
 0x329   : > { %2714 = vpow2.f32 %v2167_v57  ;;  %v2169_v35 = vmul.f32 -1.442695, %v1340_v21 }
 0x32a   : > { %2716 = vpow2.f32 %v2168_v12 }
 0x32b   : > { %2718 = vpow2.f32 %v2169_v35  ;;  %v1343_v55 = vpop.f32.mrb[20].mxu1 }
 0x32c   : > { %v1344_v5 = vadd.f32 %v1343_v55, %v3766_v33  ;;  %v1345_v42 = vpop.f32.mrb[21].mxu1 }
 0x32d   : > { %v1346_v20 = vadd.f32 %v1345_v42, %v3768_v36  ;;  %v1347_v28 = vpop.f32.mrb[22].mxu1 }
 0x32e   : > { %v2170_v60 = vmul.f32 -1.442695, %v1344_v5  ;;  %v1348_v8 = vadd.f32 %v1347_v28, %v3766_v33  ;;  %v1349_v37 = vpop.f32.mrb[23].mxu1 }
 0x32f   : > { %v2171_v0 = vmul.f32 -1.442695, %v1346_v20  ;;  %v1350_v1 = vadd.f32 %v1349_v37, %v3768_v36 }
 0x330   : > { %2720 = vpow2.f32 %v2170_v60  ;;  %v2172_v26 = vmul.f32 -1.442695, %v1348_v8 }
 0x331   : > { %2722 = vpow2.f32 %v2171_v0  ;;  %v2173_v47 = vmul.f32 -1.442695, %v1350_v1 }
 0x332   : > { %v2713_v9 = vpop.eup %2712  ;;  %2724 = vpow2.f32 %v2172_v26 }
 0x333   : > { %v2715_v10 = vpop.eup %2714  ;;  %v1684_v11 = vadd.f32 1.0, %v2713_v9  ;;  %2726 = vpow2.f32 %v2173_v47  ;;  %v1353_v30 = vpop.f32.mrb[24].mxu1 }
 0x334   : > { %v2717_v41 = vpop.eup %2716  ;;  %v1685_v19 = vadd.f32 1.0, %v2715_v10  ;;  %v1354_v22 = vadd.f32 %v1353_v30, %v3766_v33  ;;  %v1355_v16 = vpop.f32.mrb[25].mxu1 }
 0x335   : > { %v2719_v31 = vpop.eup %2718  ;;  %2728 = vrcp.f32 %v1684_v11  ;;  %v1686_v23 = vadd.f32 1.0, %v2717_v41  ;;  %v1356_v24 = vadd.f32 %v1355_v16, %v3768_v36  ;;  %v1357_v25 = vpop.f32.mrb[26].mxu1 }
 0x336   : > { %2730 = vrcp.f32 %v1685_v19  ;;  %v1687_v27 = vadd.f32 1.0, %v2719_v31  ;;  %v2174_v62 = vmul.f32 -1.442695, %v1354_v22  ;;  %v1358_v29 = vadd.f32 %v1357_v25, %v3766_v33  ;;  %v1359_v17 = vpop.f32.mrb[27].mxu1 }
 0x337   : > { %2732 = vrcp.f32 %v1686_v23  ;;  %v2175_v2 = vmul.f32 -1.442695, %v1356_v24  ;;  %v1360_v40 = vadd.f32 %v1359_v17, %v3768_v36 }
 0x338   : > { %2734 = vrcp.f32 %v1687_v27  ;;  %v2176_v46 = vmul.f32 -1.442695, %v1358_v29 }
 0x339   : > { %2736 = vpow2.f32 %v2174_v62  ;;  %v2177_v56 = vmul.f32 -1.442695, %v1360_v40 }
 0x33a   : > { %v2721_v39 = vpop.eup %2720  ;;  %2738 = vpow2.f32 %v2175_v2 }
 0x33b   : > { %v2723_v3 = vpop.eup %2722  ;;  %v1688_v49 = vadd.f32 1.0, %v2721_v39  ;;  %2740 = vpow2.f32 %v2176_v46  ;;  %v1363_v14 = vpop.f32.mrb[28].mxu1 }
 0x33c   : > { %v2725_v52 = vpop.eup %2724  ;;  %v1689_v51 = vadd.f32 1.0, %v2723_v3  ;;  %2742 = vpow2.f32 %v2177_v56  ;;  %v1364_v54 = vadd.f32 %v1363_v14, %v3766_v33  ;;  %v1365_v43 = vpop.f32.mrb[29].mxu1 }
 0x33d   : > { %v2727_v58 = vpop.eup %2726  ;;  %2744 = vrcp.f32 %v1688_v49  ;;  %v1690_v59 = vadd.f32 1.0, %v2725_v52  ;;  %v1366_v61 = vadd.f32 %v1365_v43, %v3768_v36  ;;  %v1367_v63 = vpop.f32.mrb[30].mxu1 }
 0x33e   : > { %2746 = vrcp.f32 %v1689_v51  ;;  %v1691_v53 = vadd.f32 1.0, %v2727_v58  ;;  %v2178_v38 = vmul.f32 -1.442695, %v1364_v54  ;;  %v1368_v48 = vadd.f32 %v1367_v63, %v3766_v33  ;;  %v1369_v18 = vpop.f32.mrb[31].mxu1 }
 0x33f   : > { %v2729_v7 = vpop.eup %2728  ;;  %2748 = vrcp.f32 %v1690_v59  ;;  %v2179_v13 = vmul.f32 -1.442695, %v1366_v61  ;;  %v1370_v6 = vadd.f32 %v1369_v18, %v3768_v36 }
 0x340   : > { %v2731_v32 = vpop.eup %2730  ;;  %1876 = vst [vmem:[%s3787_s7] sm:$0xff] %v2729_v7  ;;  %2750 = vrcp.f32 %v1691_v53  ;;  %v2180_v4 = vmul.f32 -1.442695, %v1368_v48 }
 0x341   : > { %v2733_v15 = vpop.eup %2732  ;;  %1877 = vst [vmem:[%s3787_s7 + $0x8] sm:$0xff] %v2731_v32  ;;  %2752 = vpow2.f32 %v2178_v38  ;;  %v2181_v34 = vmul.f32 -1.442695, %v1370_v6 }
 0x342   : > { %v2735_v45 = vpop.eup %2734  ;;  %1878 = vst [vmem:[%s3787_s7 + $0x10] sm:$0xff] %v2733_v15  ;;  %2754 = vpow2.f32 %v2179_v13 }
 0x343   : > { %v2737_v50 = vpop.eup %2736  ;;  %1879 = vst [vmem:[%s3787_s7 + $0x18] sm:$0xff] %v2735_v45  ;;  %2756 = vpow2.f32 %v2180_v4  ;;  %v1373_v44 = vpop.f32.mrb[32].mxu1 }
 0x344   : > { %v2739_v57 = vpop.eup %2738  ;;  %v1692_v21 = vadd.f32 1.0, %v2737_v50  ;;  %2758 = vpow2.f32 %v2181_v34  ;;  %v1374_v12 = vadd.f32 %v1373_v44, %v3766_v33  ;;  %v1375_v35 = vpop.f32.mrb[33].mxu1 }
 0x345   : > { %v2741_v55 = vpop.eup %2740  ;;  %v1693_v5 = vadd.f32 1.0, %v2739_v57  ;;  %v1376_v42 = vadd.f32 %v1375_v35, %v3768_v36  ;;  %v1377_v20 = vpop.f32.mrb[34].mxu1 }
 0x346   : > { %v2743_v28 = vpop.eup %2742  ;;  %2760 = vrcp.f32 %v1692_v21  ;;  %v1694_v60 = vadd.f32 1.0, %v2741_v55  ;;  %v2182_v8 = vmul.f32 -1.442695, %v1374_v12  ;;  %v1378_v37 = vadd.f32 %v1377_v20, %v3766_v33  ;;  %v1379_v0 = vpop.f32.mrb[35].mxu1 }
 0x347   : > { %v2745_v1 = vpop.eup %2744  ;;  %2762 = vrcp.f32 %v1693_v5  ;;  %v1695_v26 = vadd.f32 1.0, %v2743_v28  ;;  %v2183_v47 = vmul.f32 -1.442695, %v1376_v42  ;;  %v1380_v9 = vadd.f32 %v1379_v0, %v3768_v36 }
 0x348   : > { %v2747_v10 = vpop.eup %2746  ;;  %1880 = vst [vmem:[%s3787_s7 + $0x20] sm:$0xff] %v2745_v1  ;;  %2764 = vrcp.f32 %v1694_v60  ;;  %v2184_v11 = vmul.f32 -1.442695, %v1378_v37 }
 0x349   : > { %v2749_v30 = vpop.eup %2748  ;;  %1881 = vst [vmem:[%s3787_s7 + $0x28] sm:$0xff] %v2747_v10  ;;  %2766 = vrcp.f32 %v1695_v26  ;;  %v2185_v41 = vmul.f32 -1.442695, %v1380_v9 }
 0x34a   : > { %v2751_v19 = vpop.eup %2750  ;;  %1882 = vst [vmem:[%s3787_s7 + $0x30] sm:$0xff] %v2749_v30  ;;  %2768 = vpow2.f32 %v2182_v8 }
 0x34b   : > { %v2753_v22 = vpop.eup %2752  ;;  %1883 = vst [vmem:[%s3787_s7 + $0x38] sm:$0xff] %v2751_v19  ;;  %2770 = vpow2.f32 %v2183_v47  ;;  %v1383_v16 = vpop.f32.mrb[36].mxu1 }
 0x34c   : > { %v2755_v31 = vpop.eup %2754  ;;  %v1696_v23 = vadd.f32 1.0, %v2753_v22  ;;  %2772 = vpow2.f32 %v2184_v11  ;;  %v1384_v24 = vadd.f32 %v1383_v16, %v3766_v33  ;;  %v1385_v25 = vpop.f32.mrb[37].mxu1 }
 0x34d   : > { %v2757_v27 = vpop.eup %2756  ;;  %v1697_v62 = vadd.f32 1.0, %v2755_v31  ;;  %2774 = vpow2.f32 %v2185_v41  ;;  %v1386_v29 = vadd.f32 %v1385_v25, %v3768_v36  ;;  %v1387_v17 = vpop.f32.mrb[38].mxu1 }
 0x34e   : > { %v2759_v2 = vpop.eup %2758  ;;  %2776 = vrcp.f32 %v1696_v23  ;;  %v1698_v40 = vadd.f32 1.0, %v2757_v27  ;;  %v2186_v46 = vmul.f32 -1.442695, %v1384_v24  ;;  %v1388_v56 = vadd.f32 %v1387_v17, %v3766_v33  ;;  %v1389_v39 = vpop.f32.mrb[39].mxu1 }
 0x34f   : > { %2778 = vrcp.f32 %v1697_v62  ;;  %v1699_v3 = vadd.f32 1.0, %v2759_v2  ;;  %v2187_v49 = vmul.f32 -1.442695, %v1386_v29  ;;  %v1390_v14 = vadd.f32 %v1389_v39, %v3768_v36 }
 0x350   : > { %v2761_v52 = vpop.eup %2760  ;;  %2780 = vrcp.f32 %v1698_v40  ;;  %v2188_v51 = vmul.f32 -1.442695, %v1388_v56 }
 0x351   : > { %v2763_v54 = vpop.eup %2762  ;;  %1884 = vst [vmem:[%s3787_s7 + $0x40] sm:$0xff] %v2761_v52  ;;  %2782 = vrcp.f32 %v1699_v3  ;;  %v2189_v43 = vmul.f32 -1.442695, %v1390_v14 }
 0x352   : > { %v2765_v58 = vpop.eup %2764  ;;  %1885 = vst [vmem:[%s3787_s7 + $0x48] sm:$0xff] %v2763_v54  ;;  %2784 = vpow2.f32 %v2186_v46 }
 0x353   : > { %v2767_v59 = vpop.eup %2766  ;;  %1886 = vst [vmem:[%s3787_s7 + $0x50] sm:$0xff] %v2765_v58  ;;  %2786 = vpow2.f32 %v2187_v49  ;;  %v1393_v61 = vpop.f32.mrb[40].mxu1 }
 0x354   : > { %v2769_v63 = vpop.eup %2768  ;;  %1887 = vst [vmem:[%s3787_s7 + $0x58] sm:$0xff] %v2767_v59  ;;  %2788 = vpow2.f32 %v2188_v51  ;;  %v1394_v53 = vadd.f32 %v1393_v61, %v3766_v33  ;;  %v1395_v38 = vpop.f32.mrb[41].mxu1 }
 0x355   : > { %v2771_v48 = vpop.eup %2770  ;;  %v1700_v18 = vadd.f32 1.0, %v2769_v63  ;;  %2790 = vpow2.f32 %v2189_v43  ;;  %v1396_v7 = vadd.f32 %v1395_v38, %v3768_v36  ;;  %v1397_v13 = vpop.f32.mrb[42].mxu1 }
 0x356   : > { %v2773_v6 = vpop.eup %2772  ;;  %v1701_v32 = vadd.f32 1.0, %v2771_v48  ;;  %v1398_v4 = vadd.f32 %v1397_v13, %v3766_v33  ;;  %v1399_v15 = vpop.f32.mrb[43].mxu1  ;;  %v2190_v50 = vmul.f32 -1.442695, %v1394_v53 }
 0x357   : > { %v2775_v34 = vpop.eup %2774  ;;  %2792 = vrcp.f32 %v1700_v18  ;;  %v1702_v45 = vadd.f32 1.0, %v2773_v6  ;;  %v1400_v44 = vadd.f32 %v1399_v15, %v3768_v36  ;;  %v2191_v12 = vmul.f32 -1.442695, %v1396_v7 }
 0x358   : > { %v2777_v57 = vpop.eup %2776  ;;  %2794 = vrcp.f32 %v1701_v32  ;;  %v1703_v21 = vadd.f32 1.0, %v2775_v34  ;;  %v2192_v55 = vmul.f32 -1.442695, %v1398_v4 }
 0x359   : > { %v2779_v35 = vpop.eup %2778  ;;  %1888 = vst [vmem:[%s3787_s7 + $0x60] sm:$0xff] %v2777_v57  ;;  %2796 = vrcp.f32 %v1702_v45  ;;  %v2193_v42 = vmul.f32 -1.442695, %v1400_v44 }
 0x35a   : > { %v2781_v5 = vpop.eup %2780  ;;  %1889 = vst [vmem:[%s3787_s7 + $0x68] sm:$0xff] %v2779_v35  ;;  %2798 = vrcp.f32 %v1703_v21 }
 0x35b   : > { %v2783_v20 = vpop.eup %2782  ;;  %1890 = vst [vmem:[%s3787_s7 + $0x70] sm:$0xff] %v2781_v5  ;;  %2800 = vpow2.f32 %v2190_v50  ;;  %v1403_v28 = vpop.f32.mrb[44].mxu1 }
 0x35c   : > { %v2785_v60 = vpop.eup %2784  ;;  %1891 = vst [vmem:[%s3787_s7 + $0x78] sm:$0xff] %v2783_v20  ;;  %2802 = vpow2.f32 %v2191_v12  ;;  %v1404_v8 = vadd.f32 %v1403_v28, %v3766_v33  ;;  %v1405_v37 = vpop.f32.mrb[45].mxu1 }
 0x35d   : > { %v2787_v0 = vpop.eup %2786  ;;  %v1704_v1 = vadd.f32 1.0, %v2785_v60  ;;  %2804 = vpow2.f32 %v2192_v55  ;;  %v1406_v26 = vadd.f32 %v1405_v37, %v3768_v36  ;;  %v1407_v47 = vpop.f32.mrb[46].mxu1 }
 0x35e   : > { %v2789_v9 = vpop.eup %2788  ;;  %v1705_v10 = vadd.f32 1.0, %v2787_v0  ;;  %2806 = vpow2.f32 %v2193_v42  ;;  %v1408_v11 = vadd.f32 %v1407_v47, %v3766_v33  ;;  %v1409_v30 = vpop.f32.mrb[47].mxu1  ;;  %v2194_v22 = vmul.f32 -1.442695, %v1404_v8 }
 0x35f   : > { %v2791_v41 = vpop.eup %2790  ;;  %2808 = vrcp.f32 %v1704_v1  ;;  %v1706_v19 = vadd.f32 1.0, %v2789_v9  ;;  %v1410_v16 = vadd.f32 %v1409_v30, %v3768_v36  ;;  %v2195_v23 = vmul.f32 -1.442695, %v1406_v26 }
 0x360   : > { %2810 = vrcp.f32 %v1705_v10  ;;  %v1707_v31 = vadd.f32 1.0, %v2791_v41  ;;  %v2196_v25 = vmul.f32 -1.442695, %v1408_v11 }
 0x361   : > { %v2793_v24 = vpop.eup %2792  ;;  %2812 = vrcp.f32 %v1706_v19  ;;  %v2197_v62 = vmul.f32 -1.442695, %v1410_v16 }
 0x362   : > { %v2795_v27 = vpop.eup %2794  ;;  %1892 = vst [vmem:[%s3787_s7 + $0x80] sm:$0xff] %v2793_v24  ;;  %2814 = vrcp.f32 %v1707_v31 }
 0x363   : > { %v2797_v29 = vpop.eup %2796  ;;  %1893 = vst [vmem:[%s3787_s7 + $0x88] sm:$0xff] %v2795_v27  ;;  %2816 = vpow2.f32 %v2194_v22  ;;  %v1413_v17 = vpop.f32.mrb[48].mxu1 }
 0x364   : > { %v2799_v2 = vpop.eup %2798  ;;  %1894 = vst [vmem:[%s3787_s7 + $0x90] sm:$0xff] %v2797_v29  ;;  %2818 = vpow2.f32 %v2195_v23  ;;  %v1414_v40 = vadd.f32 %v1413_v17, %v3766_v33  ;;  %v1415_v46 = vpop.f32.mrb[49].mxu1 }
 0x365   : > { %v2801_v56 = vpop.eup %2800  ;;  %1895 = vst [vmem:[%s3787_s7 + $0x98] sm:$0xff] %v2799_v2  ;;  %2820 = vpow2.f32 %v2196_v25  ;;  %v1416_v39 = vadd.f32 %v1415_v46, %v3768_v36  ;;  %v1417_v3 = vpop.f32.mrb[50].mxu1 }
 0x366   : > { %v2803_v49 = vpop.eup %2802  ;;  %v1708_v14 = vadd.f32 1.0, %v2801_v56  ;;  %2822 = vpow2.f32 %v2197_v62  ;;  %v1418_v52 = vadd.f32 %v1417_v3, %v3766_v33  ;;  %v1419_v51 = vpop.f32.mrb[51].mxu1  ;;  %v2198_v63 = vmul.f32 -1.442695, %v1414_v40 }
 0x367   : > { %v2805_v54 = vpop.eup %2804  ;;  %v1709_v43 = vadd.f32 1.0, %v2803_v49  ;;  %v1420_v58 = vadd.f32 %v1419_v51, %v3768_v36  ;;  %v2199_v48 = vmul.f32 -1.442695, %v1416_v39 }
 0x368   : > { %v2807_v59 = vpop.eup %2806  ;;  %2824 = vrcp.f32 %v1708_v14  ;;  %v1710_v61 = vadd.f32 1.0, %v2805_v54  ;;  %v2200_v7 = vmul.f32 -1.442695, %v1418_v52 }
 0x369   : > { %v2809_v53 = vpop.eup %2808  ;;  %2826 = vrcp.f32 %v1709_v43  ;;  %v1711_v38 = vadd.f32 1.0, %v2807_v59  ;;  %v2201_v6 = vmul.f32 -1.442695, %v1420_v58 }
 0x36a   : > { %v2811_v18 = vpop.eup %2810  ;;  %1896 = vst [vmem:[%s3787_s7 + $0xa0] sm:$0xff] %v2809_v53  ;;  %2828 = vrcp.f32 %v1710_v61 }
 0x36b   : > { %v2813_v13 = vpop.eup %2812  ;;  %1897 = vst [vmem:[%s3787_s7 + $0xa8] sm:$0xff] %v2811_v18  ;;  %2830 = vrcp.f32 %v1711_v38  ;;  %v1423_v32 = vpop.f32.mrb[52].mxu1 }
 0x36c   : > { %v2815_v4 = vpop.eup %2814  ;;  %1898 = vst [vmem:[%s3787_s7 + $0xb0] sm:$0xff] %v2813_v13  ;;  %2832 = vpow2.f32 %v2198_v63  ;;  %v1424_v15 = vadd.f32 %v1423_v32, %v3766_v33  ;;  %v1425_v34 = vpop.f32.mrb[53].mxu1 }
 0x36d   : > { %v2817_v45 = vpop.eup %2816  ;;  %1899 = vst [vmem:[%s3787_s7 + $0xb8] sm:$0xff] %v2815_v4  ;;  %2834 = vpow2.f32 %v2199_v48  ;;  %v1426_v50 = vadd.f32 %v1425_v34, %v3768_v36  ;;  %v1427_v44 = vpop.f32.mrb[54].mxu1 }
 0x36e   : > { %v2819_v57 = vpop.eup %2818  ;;  %v1712_v21 = vadd.f32 1.0, %v2817_v45  ;;  %2836 = vpow2.f32 %v2200_v7  ;;  %v1428_v12 = vadd.f32 %v1427_v44, %v3766_v33  ;;  %v1429_v35 = vpop.f32.mrb[55].mxu1  ;;  %v2202_v60 = vmul.f32 -1.442695, %v1424_v15 }
 0x36f   : > { %v2821_v55 = vpop.eup %2820  ;;  %v1713_v5 = vadd.f32 1.0, %v2819_v57  ;;  %2838 = vpow2.f32 %v2201_v6  ;;  %v1430_v42 = vadd.f32 %v1429_v35, %v3768_v36  ;;  %v2203_v37 = vmul.f32 -1.442695, %v1426_v50 }
 0x370   : > { %v2823_v20 = vpop.eup %2822  ;;  %2840 = vrcp.f32 %v1712_v21  ;;  %v1714_v28 = vadd.f32 1.0, %v2821_v55  ;;  %v2204_v1 = vmul.f32 -1.442695, %v1428_v12 }
 0x371   : > { %2842 = vrcp.f32 %v1713_v5  ;;  %v1715_v8 = vadd.f32 1.0, %v2823_v20  ;;  %v2205_v47 = vmul.f32 -1.442695, %v1430_v42 }
 0x372   : > { %v2825_v0 = vpop.eup %2824  ;;  %2844 = vrcp.f32 %v1714_v28 }
 0x373   : > { %v2827_v26 = vpop.eup %2826  ;;  %1900 = vst [vmem:[%s3787_s7 + $0xc0] sm:$0xff] %v2825_v0  ;;  %2846 = vrcp.f32 %v1715_v8  ;;  %v1433_v9 = vpop.f32.mrb[56].mxu1 }
 0x374   : > { %v2829_v10 = vpop.eup %2828  ;;  %1901 = vst [vmem:[%s3787_s7 + $0xc8] sm:$0xff] %v2827_v26  ;;  %2848 = vpow2.f32 %v2202_v60  ;;  %v1434_v11 = vadd.f32 %v1433_v9, %v3766_v33  ;;  %v1435_v30 = vpop.f32.mrb[57].mxu1 }
 0x375   : > { %v2831_v41 = vpop.eup %2830  ;;  %1902 = vst [vmem:[%s3787_s7 + $0xd0] sm:$0xff] %v2829_v10  ;;  %2850 = vpow2.f32 %v2203_v37  ;;  %v1436_v19 = vadd.f32 %v1435_v30, %v3768_v36  ;;  %v1437_v22 = vpop.f32.mrb[58].mxu1 }
 0x376   : > { %v2833_v16 = vpop.eup %2832  ;;  %1903 = vst [vmem:[%s3787_s7 + $0xd8] sm:$0xff] %v2831_v41  ;;  %2852 = vpow2.f32 %v2204_v1  ;;  %v2206_v31 = vmul.f32 -1.442695, %v1434_v11  ;;  %v1438_v23 = vadd.f32 %v1437_v22, %v3766_v33  ;;  %v1439_v24 = vpop.f32.mrb[59].mxu1 }
 0x377   : > { %v2835_v25 = vpop.eup %2834  ;;  %v1716_v27 = vadd.f32 1.0, %v2833_v16  ;;  %2854 = vpow2.f32 %v2205_v47  ;;  %v1440_v62 = vadd.f32 %v1439_v24, %v3768_v36  ;;  %v2207_v46 = vmul.f32 -1.442695, %v1436_v19 }
 0x378   : > { %v2837_v29 = vpop.eup %2836  ;;  %v1717_v17 = vadd.f32 1.0, %v2835_v25  ;;  %2856 = vpow2.f32 %v2206_v31  ;;  %v2208_v3 = vmul.f32 -1.442695, %v1438_v23 }
 0x379   : > { %v2839_v2 = vpop.eup %2838  ;;  %2858 = vrcp.f32 %v1716_v27  ;;  %v1718_v40 = vadd.f32 1.0, %v2837_v29  ;;  %v2209_v14 = vmul.f32 -1.442695, %v1440_v62 }
 0x37a   : > { %v2841_v56 = vpop.eup %2840  ;;  %2860 = vrcp.f32 %v1717_v17  ;;  %v1719_v39 = vadd.f32 1.0, %v2839_v2 }
 0x37b   : > { %v2843_v49 = vpop.eup %2842  ;;  %1904 = vst [vmem:[%s3787_s7 + $0xe0] sm:$0xff] %v2841_v56  ;;  %2862 = vrcp.f32 %v1718_v40  ;;  %v1443_v52 = vpop.f32.mrb[60].mxu1 }
 0x37c   : > { %v2845_v51 = vpop.eup %2844  ;;  %1905 = vst [vmem:[%s3787_s7 + $0xe8] sm:$0xff] %v2843_v49  ;;  %2864 = vrcp.f32 %v1719_v39  ;;  %v1444_v54 = vadd.f32 %v1443_v52, %v3766_v33  ;;  %v1445_v43 = vpop.f32.mrb[61].mxu1 }
 0x37d   : > { %v2847_v58 = vpop.eup %2846  ;;  %1906 = vst [vmem:[%s3787_s7 + $0xf0] sm:$0xff] %v2845_v51  ;;  %2866 = vpow2.f32 %v2207_v46  ;;  %v1447_v59 = vpop.f32.mrb[62].mxu1  ;;  %v1446_v53 = vadd.f32 %v1445_v43, %v3768_v36 }
 0x37e   : > { %v2849_v61 = vpop.eup %2848  ;;  %1907 = vst [vmem:[%s3787_s7 + $0xf8] sm:$0xff] %v2847_v58  ;;  %2868 = vpow2.f32 %v2208_v3  ;;  %v2210_v63 = vmul.f32 -1.442695, %v1444_v54  ;;  %v1449_v38 = vpop.f32.mrb[63].mxu1  ;;  %v1448_v7 = vadd.f32 %v1447_v59, %v3766_v33 }
 0x37f   : > { %v2851_v48 = vpop.eup %2850  ;;  %v1720_v18 = vadd.f32 1.0, %v2849_v61  ;;  %2870 = vpow2.f32 %v2209_v14  ;;  %v1450_v32 = vadd.f32 %v1449_v38, %v3768_v36  ;;  %v2211_v50 = vmul.f32 -1.442695, %v1446_v53 }
 0x380   : > { %v2853_v13 = vpop.eup %2852  ;;  %v1721_v6 = vadd.f32 1.0, %v2851_v48  ;;  %2872 = vpow2.f32 %v2210_v63  ;;  %v2212_v21 = vmul.f32 -1.442695, %v1448_v7 }
 0x381   : > { %v2855_v4 = vpop.eup %2854  ;;  %2874 = vrcp.f32 %v1720_v18  ;;  %v1722_v15 = vadd.f32 1.0, %v2853_v13  ;;  %v2213_v55 = vmul.f32 -1.442695, %v1450_v32 }
 0x382   : > { %v2857_v34 = vpop.eup %2856  ;;  %2876 = vrcp.f32 %v1721_v6  ;;  %v1723_v45 = vadd.f32 1.0, %v2855_v4 }
 0x383   : > { %v2859_v44 = vpop.eup %2858  ;;  %2878 = vrcp.f32 %v1722_v15  ;;  %v1724_v57 = vadd.f32 1.0, %v2857_v34  ;;  %v1453_v12 = vpop.f32.mrb[64].mxu1 }
 0x384   : > { %v2861_v35 = vpop.eup %2860  ;;  %1908 = vst [vmem:[%s3787_s7 + $0x100] sm:$0xff] %v2859_v44  ;;  %2880 = vrcp.f32 %v1723_v45  ;;  %v1454_v5 = vadd.f32 %v1453_v12, %v3766_v33  ;;  %v1455_v42 = vpop.f32.mrb[65].mxu1 }
 0x385   : > { %v2863_v20 = vpop.eup %2862  ;;  %1909 = vst [vmem:[%s3787_s7 + $0x108] sm:$0xff] %v2861_v35  ;;  %2882 = vrcp.f32 %v1724_v57  ;;  %v1457_v28 = vpop.f32.mrb[66].mxu1  ;;  %v1456_v37 = vadd.f32 %v1455_v42, %v3768_v36 }
 0x386   : > { %v2865_v60 = vpop.eup %2864  ;;  %1910 = vst [vmem:[%s3787_s7 + $0x110] sm:$0xff] %v2863_v20  ;;  %2884 = vpow2.f32 %v2211_v50  ;;  %v2214_v8 = vmul.f32 -1.442695, %v1454_v5  ;;  %v1459_v0 = vpop.f32.mrb[67].mxu1  ;;  %v1458_v26 = vadd.f32 %v1457_v28, %v3766_v33 }
 0x387   : > { %v2867_v1 = vpop.eup %2866  ;;  %1911 = vst [vmem:[%s3787_s7 + $0x118] sm:$0xff] %v2865_v60  ;;  %2886 = vpow2.f32 %v2212_v21  ;;  %v1460_v10 = vadd.f32 %v1459_v0, %v3768_v36  ;;  %v2215_v22 = vmul.f32 -1.442695, %v1456_v37 }
 0x388   : > { %v2869_v47 = vpop.eup %2868  ;;  %v1725_v9 = vadd.f32 1.0, %v2867_v1  ;;  %2888 = vpow2.f32 %v2213_v55  ;;  %v2216_v23 = vmul.f32 -1.442695, %v1458_v26 }
 0x389   : > { %v2871_v11 = vpop.eup %2870  ;;  %v1726_v30 = vadd.f32 1.0, %v2869_v47  ;;  %2890 = vpow2.f32 %v2214_v8  ;;  %v2217_v27 = vmul.f32 -1.442695, %v1460_v10 }
 0x38a   : > { %v2873_v41 = vpop.eup %2872  ;;  %2892 = vrcp.f32 %v1725_v9  ;;  %v1727_v19 = vadd.f32 1.0, %v2871_v11 }
 0x38b   : > { %v2875_v16 = vpop.eup %2874  ;;  %2894 = vrcp.f32 %v1726_v30  ;;  %v1728_v31 = vadd.f32 1.0, %v2873_v41  ;;  %v1463_v24 = vpop.f32.mrb[68].mxu1 }
 0x38c   : > { %v2877_v25 = vpop.eup %2876  ;;  %1912 = vst [vmem:[%s3787_s7 + $0x120] sm:$0xff] %v2875_v16  ;;  %2896 = vrcp.f32 %v1727_v19  ;;  %v1464_v62 = vadd.f32 %v1463_v24, %v3766_v33  ;;  %v1465_v29 = vpop.f32.mrb[69].mxu1 }
 0x38d   : > { %v2879_v17 = vpop.eup %2878  ;;  %1913 = vst [vmem:[%s3787_s7 + $0x128] sm:$0xff] %v2877_v25  ;;  %2898 = vrcp.f32 %v1728_v31  ;;  %v1466_v2 = vadd.f32 %v1465_v29, %v3768_v36  ;;  %v1467_v40 = vpop.f32.mrb[70].mxu1 }
 0x38e   : > { %v2881_v46 = vpop.eup %2880  ;;  %1914 = vst [vmem:[%s3787_s7 + $0x130] sm:$0xff] %v2879_v17  ;;  %2900 = vpow2.f32 %v2215_v22  ;;  %v2218_v56 = vmul.f32 -1.442695, %v1464_v62  ;;  %v1469_v39 = vpop.f32.mrb[71].mxu1  ;;  %v1468_v14 = vadd.f32 %v1467_v40, %v3766_v33 }
 0x38f   : > { %v2883_v3 = vpop.eup %2882  ;;  %1915 = vst [vmem:[%s3787_s7 + $0x138] sm:$0xff] %v2881_v46  ;;  %2902 = vpow2.f32 %v2216_v23  ;;  %v2219_v49 = vmul.f32 -1.442695, %v1466_v2  ;;  %v1470_v51 = vadd.f32 %v1469_v39, %v3768_v36 }
 0x390   : > { %v2885_v52 = vpop.eup %2884  ;;  %1916 = vst [vmem:[%s3787_s7 + $0x140] sm:$0xff] %v2883_v3  ;;  %2904 = vpow2.f32 %v2217_v27  ;;  %v2220_v53 = vmul.f32 -1.442695, %v1468_v14 }
 0x391   : > { %v2887_v54 = vpop.eup %2886  ;;  %v1729_v43 = vadd.f32 1.0, %v2885_v52  ;;  %2906 = vpow2.f32 %v2218_v56  ;;  %v2221_v7 = vmul.f32 -1.442695, %v1470_v51 }
 0x392   : > { %v2889_v58 = vpop.eup %2888  ;;  %v1730_v59 = vadd.f32 1.0, %v2887_v54  ;;  %2908 = vpow2.f32 %v2219_v49 }
 0x393   : > { %v2891_v61 = vpop.eup %2890  ;;  %2910 = vrcp.f32 %v1729_v43  ;;  %v1731_v63 = vadd.f32 1.0, %v2889_v58  ;;  %v1473_v38 = vpop.f32.mrb[72].mxu1 }
 0x394   : > { %v2893_v48 = vpop.eup %2892  ;;  %2912 = vrcp.f32 %v1730_v59  ;;  %v1732_v18 = vadd.f32 1.0, %v2891_v61  ;;  %v1474_v13 = vadd.f32 %v1473_v38, %v3766_v33  ;;  %v1475_v6 = vpop.f32.mrb[73].mxu1 }
 0x395   : > { %v2895_v32 = vpop.eup %2894  ;;  %1917 = vst [vmem:[%s3787_s7 + $0x148] sm:$0xff] %v2893_v48  ;;  %2914 = vrcp.f32 %v1731_v63  ;;  %v1476_v4 = vadd.f32 %v1475_v6, %v3768_v36  ;;  %v1477_v15 = vpop.f32.mrb[74].mxu1 }
 0x396   : > { %v2897_v34 = vpop.eup %2896  ;;  %1918 = vst [vmem:[%s3787_s7 + $0x150] sm:$0xff] %v2895_v32  ;;  %2916 = vrcp.f32 %v1732_v18  ;;  %v2222_v45 = vmul.f32 -1.442695, %v1474_v13  ;;  %v1479_v50 = vpop.f32.mrb[75].mxu1  ;;  %v1478_v12 = vadd.f32 %v1477_v15, %v3766_v33 }
 0x397   : > { %v2899_v44 = vpop.eup %2898  ;;  %1919 = vst [vmem:[%s3787_s7 + $0x158] sm:$0xff] %v2897_v34  ;;  %2918 = vpow2.f32 %v2220_v53  ;;  %v2223_v57 = vmul.f32 -1.442695, %v1476_v4  ;;  %v1480_v5 = vadd.f32 %v1479_v50, %v3768_v36 }
 0x398   : > { %v2901_v21 = vpop.eup %2900  ;;  %1920 = vst [vmem:[%s3787_s7 + $0x160] sm:$0xff] %v2899_v44  ;;  %2920 = vpow2.f32 %v2221_v7  ;;  %v2224_v1 = vmul.f32 -1.442695, %v1478_v12 }
 0x399   : > { %v2903_v35 = vpop.eup %2902  ;;  %v1733_v55 = vadd.f32 1.0, %v2901_v21  ;;  %2922 = vpow2.f32 %v2222_v45  ;;  %v2225_v11 = vmul.f32 -1.442695, %v1480_v5 }
 0x39a   : > { %v2905_v42 = vpop.eup %2904  ;;  %v1734_v20 = vadd.f32 1.0, %v2903_v35  ;;  %2924 = vpow2.f32 %v2223_v57 }
 0x39b   : > { %v2907_v28 = vpop.eup %2906  ;;  %2926 = vrcp.f32 %v1733_v55  ;;  %v1735_v60 = vadd.f32 1.0, %v2905_v42  ;;  %v1483_v8 = vpop.f32.mrb[76].mxu1 }
 0x39c   : > { %v2909_v37 = vpop.eup %2908  ;;  %2928 = vrcp.f32 %v1734_v20  ;;  %v1736_v0 = vadd.f32 1.0, %v2907_v28  ;;  %v1484_v26 = vadd.f32 %v1483_v8, %v3766_v33  ;;  %v1485_v47 = vpop.f32.mrb[77].mxu1 }
 0x39d   : > { %v2911_v9 = vpop.eup %2910  ;;  %2930 = vrcp.f32 %v1735_v60  ;;  %v1737_v10 = vadd.f32 1.0, %v2909_v37  ;;  %v1486_v30 = vadd.f32 %v1485_v47, %v3768_v36  ;;  %v1487_v41 = vpop.f32.mrb[78].mxu1 }
 0x39e   : > { %v2913_v19 = vpop.eup %2912  ;;  %1921 = vst [vmem:[%s3787_s7 + $0x168] sm:$0xff] %v2911_v9  ;;  %2932 = vrcp.f32 %v1736_v0  ;;  %v2226_v22 = vmul.f32 -1.442695, %v1484_v26  ;;  %v1489_v16 = vpop.f32.mrb[79].mxu1  ;;  %v1488_v25 = vadd.f32 %v1487_v41, %v3766_v33 }
 0x39f   : > { %v2915_v31 = vpop.eup %2914  ;;  %1922 = vst [vmem:[%s3787_s7 + $0x170] sm:$0xff] %v2913_v19  ;;  %2934 = vrcp.f32 %v1737_v10  ;;  %v2227_v23 = vmul.f32 -1.442695, %v1486_v30  ;;  %v1490_v62 = vadd.f32 %v1489_v16, %v3768_v36 }
 0x3a0   : > { %v2917_v24 = vpop.eup %2916  ;;  %1923 = vst [vmem:[%s3787_s7 + $0x178] sm:$0xff] %v2915_v31  ;;  %2936 = vpow2.f32 %v2224_v1  ;;  %v2228_v39 = vmul.f32 -1.442695, %v1488_v25 }
 0x3a1   : > { %v2919_v27 = vpop.eup %2918  ;;  %1924 = vst [vmem:[%s3787_s7 + $0x180] sm:$0xff] %v2917_v24  ;;  %2938 = vpow2.f32 %v2225_v11  ;;  %v2229_v49 = vmul.f32 -1.442695, %v1490_v62 }
 0x3a2   : > { %v2921_v29 = vpop.eup %2920  ;;  %v1738_v17 = vadd.f32 1.0, %v2919_v27  ;;  %2940 = vpow2.f32 %v2226_v22 }
 0x3a3   : > { %v2923_v2 = vpop.eup %2922  ;;  %v1739_v40 = vadd.f32 1.0, %v2921_v29  ;;  %2942 = vpow2.f32 %v2227_v23 }
 0x3a4   : > { %v2925_v46 = vpop.eup %2924  ;;  %2944 = vrcp.f32 %v1738_v17  ;;  %v1740_v56 = vadd.f32 1.0, %v2923_v2 }
 0x3a5   : > { %v2927_v33 = vpop.eup %2926  ;;  %2946 = vrcp.f32 %v1739_v40  ;;  %v1741_v3 = vadd.f32 1.0, %v2925_v46 }
 0x3a6   : > { %v2929_v36 = vpop.eup %2928  ;;  %1925 = vst [vmem:[%s3787_s7 + $0x188] sm:$0xff] %v2927_v33  ;;  %2948 = vrcp.f32 %v1740_v56 }
 0x3a7   : > { %v2931_v14 = vpop.eup %2930  ;;  %1926 = vst [vmem:[%s3787_s7 + $0x190] sm:$0xff] %v2929_v36  ;;  %2950 = vrcp.f32 %v1741_v3 }
 0x3a8   : > { %v2933_v52 = vpop.eup %2932  ;;  %1927 = vst [vmem:[%s3787_s7 + $0x198] sm:$0xff] %v2931_v14  ;;  %2952 = vpow2.f32 %v2228_v39 }
 0x3a9   : > { %v2935_v51 = vpop.eup %2934  ;;  %1928 = vst [vmem:[%s3787_s7 + $0x1a0] sm:$0xff] %v2933_v52  ;;  %2954 = vpow2.f32 %v2229_v49 }
 0x3aa   : > { %v2937_v54 = vpop.eup %2936  ;;  %1929 = vst [vmem:[%s3787_s7 + $0x1a8] sm:$0xff] %v2935_v51 }
 0x3ab   : > { %v2939_v43 = vpop.eup %2938  ;;  %v1742_v58 = vadd.f32 1.0, %v2937_v54 }
 0x3ac   : > { %v2941_v59 = vpop.eup %2940  ;;  %v1743_v61 = vadd.f32 1.0, %v2939_v43 }
 0x3ad   : > { %v2943_v63 = vpop.eup %2942  ;;  %2956 = vrcp.f32 %v1742_v58  ;;  %v1744_v53 = vadd.f32 1.0, %v2941_v59 }
 0x3ae   : > { %v2945_v38 = vpop.eup %2944  ;;  %2958 = vrcp.f32 %v1743_v61  ;;  %v1745_v48 = vadd.f32 1.0, %v2943_v63 }
 0x3af   : > { %v2947_v18 = vpop.eup %2946  ;;  %1930 = vst [vmem:[%s3787_s7 + $0x1b0] sm:$0xff] %v2945_v38  ;;  %2960 = vrcp.f32 %v1744_v53 }
 0x3b0   : > { %v2949_v7 = vpop.eup %2948  ;;  %1931 = vst [vmem:[%s3787_s7 + $0x1b8] sm:$0xff] %v2947_v18  ;;  %2962 = vrcp.f32 %v1745_v48 }
 0x3b1   : > { %v2951_v13 = vpop.eup %2950  ;;  %1932 = vst [vmem:[%s3787_s7 + $0x1c0] sm:$0xff] %v2949_v7 }
 0x3b2   : > { %v2953_v6 = vpop.eup %2952  ;;  %1933 = vst [vmem:[%s3787_s7 + $0x1c8] sm:$0xff] %v2951_v13 }
 0x3b3   : > { %v2955_v32 = vpop.eup %2954  ;;  %v1746_v4 = vadd.f32 1.0, %v2953_v6 }
 0x3b4   : > { %v1747_v15 = vadd.f32 1.0, %v2955_v32 }
 0x3b5   : > { %2964 = vrcp.f32 %v1746_v4 }
 0x3b6   : > { %2966 = vrcp.f32 %v1747_v15 }
 0x3b7   : > { %v2957_v34 = vpop.eup %2956 }
 0x3b8   : > { %v2959_v45 = vpop.eup %2958  ;;  %1934 = vst [vmem:[%s3787_s7 + $0x1d0] sm:$0xff] %v2957_v34 }
 0x3b9   : > { %v2961_v50 = vpop.eup %2960  ;;  %1935 = vst [vmem:[%s3787_s7 + $0x1d8] sm:$0xff] %v2959_v45 }
 0x3ba   : > { %v2963_v44 = vpop.eup %2962  ;;  %1936 = vst [vmem:[%s3787_s7 + $0x1e0] sm:$0xff] %v2961_v50 }
 0x3bb   : > { %1937 = vst [vmem:[%s3787_s7 + $0x1e8] sm:$0xff] %v2963_v44  ;;  %1947 = sbr.rel (!%p3996_p10) target bundleno = 990 (0x3de), region = 64 }
 0x3bf   : > { %v2965_v57 = vpop.eup %2964 }
 0x3c0   : > { %v2967_v21 = vpop.eup %2966  ;;  %1938 = vst [vmem:[%s3787_s7 + $0x1f0] sm:$0xff] %v2965_v57 }
 0x3c1   : > { %1939 = vst [vmem:[%s3787_s7 + $0x1f8] sm:$0xff] %v2967_v21 }
 0x3c2   : > { %s4008_s18 = smov (!%p1950_p1, %s1949_s18), 32 }
 0x3c3   : > { %s3905_s13 = sshll.u32 %s4008_s18, 8 }
 0x3c4   : > { %s1955_s16 = ssub.s32 8192, %s3905_s13 }
 0x3c5   : > { %1956 = vsyncadd %s1941_s1, %s1955_s16  ;;  %p2234_p4 = scmp.ne.s32.totalorder %s3905_s13, 0  ;;  %s2243_s30 = sshll.u32 %s3250_s22, 13 }
 0x3c6   : > { %s3915_s15 = scalar_lea.hbm %s3968_s5, %s2243_s30  ;;  %s1962_s8 = sshll.u32 %s3787_s7, 4  ;;  %s3918_s8 = int_to_ptr.vmem [resolvable:$true] %s1962_s8 }
 0x3c7   : > { %s3108_s23 = scalar_lea.vmem %s3918_s8, %s3905_s13  ;;  %s3196_s9 = smov [#allocation11]  }
 0x3c8   : > { %p3109_p6 = scmp.ne.s32.totalorder %s3918_s8, %s3108_s23  ;;  %s3112_s12 = sshll.u32 %s3196_s9, 4  ;;  %s3113_s12 = int_to_ptr.vmem [resolvable:$false] %s3112_s12 }
 0x3c9   : > { %s3114_s22 = scalar_lea.vmem %s3113_s12, 16384  ;;  %p3115_p11 = scmp.lt.s32.totalorder %s3918_s8, %s3113_s12 }
 0x3ca   : > { %p3110_p3 = pnand %p3109_p6, %p2234_p4  ;;  %p3116_p13 = scmp.lt.s32.totalorder %s3114_s22, %s3108_s23 }
 0x3cc   : > { %p3111_p5 = pneg %p3110_p3  ;;  %p3117_p12 = por %p3116_p13, %p3115_p11 }
 0x3ce   : > { %p3118_p0 = pnand %p3117_p12, %p3111_p5 }
 0x3d0   : > { %3121 = shalt.err (!%p3118_p0)
}
 0x3d1   : > { %s3122_s27 = scalar_lea.hbm %s3915_s15, %s3905_s13  ;;  %s3126_s6 = scalar_lea.hbm %s3968_s5, 32000 }
 0x3d2   : > { %p3123_p2 = scmp.ne.s32.totalorder %s3915_s15, %s3122_s27  ;;  %p3127_p9 = scmp.lt.u32.totalorder %s3915_s15, %s3968_s5 }
 0x3d3   : > { %p3128_p10 = scmp.lt.u32.totalorder %s3126_s6, %s3122_s27  ;;  %p3130_p6 = scmp.lt.u32.totalorder %s3122_s27, %s3915_s15 }
 0x3d4   : > { %p3124_p7 = pnand %p3123_p2, %p2234_p4 }
 0x3d5   : > { %p3129_p1 = por %p3128_p10, %p3127_p9 }
 0x3d6   : > { %p3125_p8 = pneg %p3124_p7 }
 0x3d7   : > { %p3131_p3 = por %p3130_p6, %p3129_p1 }
 0x3d9   : > { %p3132_p5 = pnand %p3131_p3, %p3125_p8 }
 0x3db   : > { %3135 = shalt.err (!%p3132_p5)
}
 0x3dc   : > { %s3197_s29 = smov 256   ;;  %s3198_s7 = smov 16  }
 0x3dd   : > { %1968 = dma.vmem_to_hbm [thread:$0]  (%p2234_p4), %s3918_s8, %s3905_s13, %s3915_s15, %s1941_s1, %s3197_s29, %s3197_s29, %s3198_s7  }
 0x3de PF: > { %s3997_s24 = sld [smem:[#allocation16_spill]]  ;;  %s3998_s18 = sld [smem:[#allocation19_spill]] }
 0x3df   : > { %p2490_p11 = scmp.ge.s32.totalorder %s3182_s21, 2 }
 0x3e4   : > { %s1977_s16 = sand.u32 1, %s3997_s24   ;;  %p3999_p13 = scmp.ne.s32.totalorder %s3998_s18, 0 }
 0x3e5   : > { %s1978_s30 = scalar_lea.sflag [#allocation4], %s1977_s16 }
 0x3e6   : > { %p2479_p12 = pnand %p2490_p11, %p3999_p13 }
 0x3e8   : > { %3165 = dma.done.wait (!%p2479_p12), %s1978_s30, 8192  }
 0x3e9   : > { %3167 = vsyncadd (!%p2479_p12), %s1978_s30, 4294959104  ;;  %s4000_s21 = sld [smem:[#allocation17_spill]]  ;;  %s4001_s25 = sld [smem:[#allocation18_spill]] }
 0x3ea   : > { %s4002_s18 = smov %s3174_s19  ;;  %s4003_s19 = smov %s3178_s20 }
 0x3ef   : > { %p20_p0 = scmp.ge.s32.totalorder %s4000_s21, 6   ;;  %s4004_s20 = smov %s4001_s25 }
 0x3f1   :  { %22 = sbr.rel (!%p20_p0) target bundleno = 9 (0x9), region = 101 }
 0x3f8   :  { %1983 = vsyncpa [#allocation3], 1 }
 0x3f9   :  { %1985 = vsyncpa [#allocation3 + $0x1], 1 }
 0x3fa   :  { %1986 = vsyncpa [#allocation6], 1 }
 0x3fb   :  { %1987 = vsyncpa [#allocation9], 1 }
 0x3fc   :  { %1988 = vsyncpa [#allocation4], 1 }
 0x3fd   :  { %1990 = vsyncpa [#allocation4 + $0x1], 1 }

</bundles_post_ra>
